<compile_context>
chip_gen: v7x
topology: tpu7x:2x2x1
jax: 0.10.0
libtpu: 0.0.40
codegen_flags: <defaults>
</compile_context>

<pallas_src>
import functools

import numpy as np

import jax
import jax.numpy as jnp
from jax import lax
from jax.experimental import pallas as pl
from jax.experimental.pallas import tpu as pltpu

BN_EPS = 1e-5


def _round_up(n, m):
    return ((n + m - 1) // m) * m


# ----------------------------------------------------------------------------
# Fused Mixer kernel: BN -> conv1 -> conv2 -> +res -> BN -> conv3 -> conv4
# (+ fused EncoderLayer epilogue, selected by `mode`)
# ----------------------------------------------------------------------------
def _mixer_kernel(x_ref, w1_ref, b1_ref, w2_ref, b2_ref, w3_ref, b3_ref,
                  w4_ref, b4_ref, o_ref, *, K, W, n_valid, mode,
                  l_true, p_true, eps):
    """Whole Mixer forward for one lane-packed block.

    x_ref  : (C, Npad) f32   channels on sublanes, batch*width on lanes
                             (lanes >= n_valid are zero padding)
    w?_ref : (C_out, K*C)    conv weights, tap-major flattened
    b?_ref : (C_out, 1)      conv bias
    o_ref  : (C, Npad)       fused output (see `mode`)
    """
    C, Npad = x_ref.shape
    pad = K // 2

    # ---- hoisted lane bookkeeping (computed once, in-kernel) ----------------
    lane = lax.broadcasted_iota(jnp.int32, (1, Npad), 1)
    wpos = lane % W                                     # within-item position
    lane_valid = (lane < n_valid).astype(jnp.float32)   # (1, Npad)
    tap_mask = {}
    for k in range(K):
        d = k - pad
        if d == 0:
            continue
        tap_mask[d] = ((wpos + d >= 0) & (wpos + d < W)).astype(jnp.float32)

    x0 = x_ref[...]
    inv_n = jnp.float32(1.0 / n_valid)

    def batch_norm(x):
        # Training-mode BatchNorm1d: per-channel stats over (batch, width),
        # biased variance, affine weight=1 / bias=0.  Pad lanes are zero so the
        # sums only need the true-count divisor; output pad lanes re-zeroed.
        s1 = jnp.sum(x, axis=1, keepdims=True)
        s2 = jnp.sum(x * x, axis=1, keepdims=True)
        mean = s1 * inv_n
        var = s2 * inv_n - mean * mean
        return (x - mean) * lax.rsqrt(var + eps) * lane_valid

    def conv_relu(x, w_ref, b_ref):
        # 'same' Conv1d as ONE MXU contraction over (K * C).  Shifted taps via
        # lane rotation (XLU) * precomputed boundary mask; the im2col stack is
        # a value (vregs), no VMEM scratch round trip.
        taps = []
        for k in range(K):
            d = k - pad
            if d == 0:
                taps.append(x)
            else:
                shifted = pltpu.roll(x, (-d) % Npad, axis=1)  # out[n] = x[n+d]
                taps.append(shifted * tap_mask[d])
        col = jnp.concatenate(taps, axis=0)                   # (K*C, Npad)
        y = jnp.dot(w_ref[...], col, preferred_element_type=jnp.float32)
        return jnp.maximum(y + b_ref[...], 0.0) * lane_valid  # bias+ReLU, pad=0

    x1 = batch_norm(x0)                      # pre_norm
    x1 = conv_relu(x1, w1_ref, b1_ref)       # conv1 + act
    x1 = conv_relu(x1, w2_ref, b2_ref)       # conv2 + act
    x1 = x1 + x0                             # residual
    x2 = batch_norm(x1)                      # middle_norm
    x2 = conv_relu(x2, w3_ref, b3_ref)       # conv3 + act
    x2 = conv_relu(x2, w4_ref, b4_ref)       # conv4 + act

    if mode == "token":
        # EncoderLayer epilogue: cat(x[:, :L-P], prediction) + src, fused here.
        parts = [x0[:l_true - p_true], x2[:p_true]]
        if C > l_true:
            parts.append(jnp.zeros((C - l_true, Npad), jnp.float32))
        o_ref[...] = x0 + jnp.concatenate(parts, axis=0)
    else:  # "ff": feed_forward(x) + src  (src == the mixer input)
        o_ref[...] = x2 + x0


def _mixer_pallas(xf, p, *, W, n_valid, mode, l_true=None, p_true=None):
    C, Npad = xf.shape
    K = p["w1"].shape[1] // C
    if mode == "ff":
        assert p["w4"].shape[0] == C, "ff mixer residual needs matching dims"

    operands = (xf, p["w1"], p["b1"], p["w2"], p["b2"],
                p["w3"], p["b3"], p["w4"], p["b4"])
    kernel = functools.partial(_mixer_kernel, K=K, W=W, n_valid=n_valid,
                               mode=mode, l_true=l_true, p_true=p_true,
                               eps=BN_EPS)
    return pl.pallas_call(
        kernel,
        out_shape=jax.ShapeDtypeStruct((C, Npad), jnp.float32),
        grid=(1,),
        in_specs=[pl.BlockSpec(op.shape, lambda i: (0, 0)) for op in operands],
        out_specs=pl.BlockSpec((C, Npad), lambda i: (0, 0)),
        compiler_params=pltpu.CompilerParams(
            dimension_semantics=("arbitrary",),
            vmem_limit_bytes=32 * 1024 * 1024),
    )(*operands)


# ----------------------------------------------------------------------------
# Packing helpers (XLA side): (B, C, W) <-> (C_pad, round_up(B*W, 128))
# ----------------------------------------------------------------------------
def _pack(x_bcw, c_pad, n_pad):
    B, C, Wd = x_bcw.shape
    xf = jnp.transpose(x_bcw, (1, 0, 2)).reshape(C, B * Wd)
    return jnp.pad(xf, ((0, c_pad - C), (0, n_pad - B * Wd)))


def _unpack(o, c_out, B, Wd):
    return jnp.transpose(o[:c_out, :B * Wd].reshape(c_out, B, Wd), (1, 0, 2))


# ----------------------------------------------------------------------------
# Model glue (plain JAX): EncoderLayer / BiAR
# ----------------------------------------------------------------------------
def encoder_layer_forward(x, p, predict_length):
    B, L, H = x.shape
    tok, ff = p["token"], p["ff"]

    # Token mixer: channels = sequence length L, conv width = hidden H.
    # Kernel returns cat(x[:, :-P], prediction) + src already fused in.
    lc = tok["w1"].shape[0]
    n_tok = _round_up(B * H, 128)
    xm = _mixer_pallas(_pack(x, lc, n_tok), tok,
                       W=H, n_valid=B * H, mode="token",
                       l_true=L, p_true=predict_length)
    x_mid = _unpack(xm, L, B, H)                      # (B, L, H)

    # Feed-forward mixer: channels = hidden H, conv width = L.
    # Kernel returns feed_forward(x) + src already fused in.
    hc = ff["w1"].shape[0]
    n_ff = _round_up(B * L, 128)
    x_ff = jnp.transpose(x_mid, (0, 2, 1))            # (B, H, L)
    ym = _mixer_pallas(_pack(x_ff, hc, n_ff), ff,
                       W=L, n_valid=B * L, mode="ff")
    y = _unpack(ym, H, B, L)                          # (B, H, L)
    return jnp.transpose(y, (0, 2, 1))                # (B, L, H)


def biar_forward(x, params, input_length, predict_length):
    B, S, H = x.shape
    if S < input_length:
        start = jnp.broadcast_to(params["start_padding"], (B, input_length, H))
        x = jnp.concatenate([start, x], axis=1)[:, -input_length:, :]
    nxt = jnp.broadcast_to(params["next_padding"], (B, predict_length, H))
    x = jnp.concatenate([x, nxt], axis=1)             # (B, L, H)
    for layer_p in params["layers"]:
        x = encoder_layer_forward(x, layer_p, predict_length)
    return x[:, -predict_length:, :]


# ----------------------------------------------------------------------------
# Deterministic parameter construction + kernel-layout packing
# ----------------------------------------------------------------------------
def init_mixer_params(key, input_dim, output_dim, ks):
    keys = jax.random.split(key, 8)

    def conv(wk, bk, cin, cout):
        w = jax.random.normal(wk, (ks, cout, cin), jnp.float32) / np.sqrt(cin * ks)
        b = jax.random.normal(bk, (cout, 1), jnp.float32) * 0.01
        return w, b

    w1, b1 = conv(keys[0], keys[1], input_dim, input_dim)
    w2, b2 = conv(keys[2], keys[3], input_dim, input_dim)
    w3, b3 = conv(keys[4], keys[5], input_dim, input_dim)
    w4, b4 = conv(keys[6], keys[7], input_dim, output_dim)
    return dict(w1=w1, b1=b1, w2=w2, b2=b2, w3=w3, b3=b3, w4=w4, b4=b4)


def pack_mixer_params(raw, input_dim, output_dim, ks):
    """Flatten conv weights to (C_out_pad, K*C_in_pad) (tap-major) and pad the
    channel dims to a multiple of 8 so every im2col row block is sublane
    aligned.  Padded channels get zero weights/bias so they stay exactly 0."""
    assert ks % 2 == 1, "Mixer assumes odd kernel size ('same' padding)."
    c_pad = _round_up(input_dim, 8)
    o_pad = _round_up(output_dim, 8)

    def pack_w(w, cout_pad):
        k, cout, cin = w.shape
        wp = jnp.zeros((k, cout_pad, c_pad), w.dtype).at[:, :cout, :cin].set(w)
        return jnp.transpose(wp, (1, 0, 2)).reshape(cout_pad, k * c_pad)

    def pack_b(b, cout_pad):
        return jnp.zeros((cout_pad, 1), b.dtype).at[:b.shape[0]].set(b)

    return dict(
        w1=pack_w(raw["w1"], c_pad), b1=pack_b(raw["b1"], c_pad),
        w2=pack_w(raw["w2"], c_pad), b2=pack_b(raw["b2"], c_pad),
        w3=pack_w(raw["w3"], c_pad), b3=pack_b(raw["b3"], c_pad),
        w4=pack_w(raw["w4"], o_pad), b4=pack_b(raw["b4"], o_pad),
    )


def init_biar_params(key, num_layers, hidden_dim, input_length, predict_length,
                     token_ks, ff_ks):
    L = input_length + predict_length
    k_next, k_start, k_layers = jax.random.split(key, 3)
    layer_keys = jax.random.split(k_layers, num_layers)
    packed_layers, raw_layers = [], []
    for lk in layer_keys:
        tk, fk = jax.random.split(lk)
        raw_tok = init_mixer_params(tk, L, predict_length, token_ks)
        raw_ff = init_mixer_params(fk, hidden_dim, hidden_dim, ff_ks)
        raw_layers.append(dict(token=raw_tok, ff=raw_ff))
        packed_layers.append(dict(
            token=pack_mixer_params(raw_tok, L, predict_length, token_ks),
            ff=pack_mixer_params(raw_ff, hidden_dim, hidden_dim, ff_ks)))
    next_padding = jax.random.normal(
        k_next, (1, predict_length, hidden_dim), jnp.float32)
    start_padding = jax.random.normal(
        k_start, (1, input_length, hidden_dim), jnp.float32)
    packed = dict(layers=packed_layers, next_padding=next_padding,
                  start_padding=start_padding)
    raw = dict(layers=raw_layers, next_padding=next_padding,
               start_padding=start_padding)
    return packed, raw


# ----------------------------------------------------------------------------
# Pure-JAX reference (unfused) for the correctness check
# ----------------------------------------------------------------------------
def _conv1d_ref(x, w, b):
    k = w.shape[0]
    pad = k // 2
    W = x.shape[-1]
    xp = jnp.pad(x, ((0, 0), (0, 0), (pad, pad)))
    out = jnp.zeros((x.shape[0], w.shape[1], W), jnp.float32) + b[None]
    for i in range(k):
        out = out + jnp.einsum("oc,bcw->bow", w[i], xp[:, :, i:i + W],
                               precision=lax.Precision.HIGHEST)
    return out


def _bn_ref(x):
    mean = jnp.mean(x, axis=(0, 2), keepdims=True)
    var = jnp.mean((x - mean) ** 2, axis=(0, 2), keepdims=True)
    return (x - mean) * lax.rsqrt(var + BN_EPS)


def _mixer_ref(x0, raw):
    x1 = _bn_ref(x0)
    x1 = jax.nn.relu(_conv1d_ref(x1, raw["w1"], raw["b1"]))
    x1 = jax.nn.relu(_conv1d_ref(x1, raw["w2"], raw["b2"]))
    x1 = x1 + x0
    x2 = _bn_ref(x1)
    x2 = jax.nn.relu(_conv1d_ref(x2, raw["w3"], raw["b3"]))
    x2 = jax.nn.relu(_conv1d_ref(x2, raw["w4"], raw["b4"]))
    return x2


def _encoder_layer_ref(x, raw, predict_length):
    src = x
    prediction = _mixer_ref(x, raw["token"])
    x = jnp.concatenate([x[:, :-predict_length, :], prediction], axis=1)
    x = src = jnp.transpose(x + src, (0, 2, 1))
    x = _mixer_ref(x, raw["ff"]) + src
    return jnp.transpose(x, (0, 2, 1))


def biar_forward_ref(x, raw_params, input_length, predict_length):
    B, S, H = x.shape
    if S < input_length:
        start = jnp.broadcast_to(raw_params["start_padding"],
                                 (B, input_length, H))
        x = jnp.concatenate([start, x], axis=1)[:, -input_length:, :]
    nxt = jnp.broadcast_to(raw_params["next_padding"], (B, predict_length, H))
    x = jnp.concatenate([x, nxt], axis=1)
    for lp in raw_params["layers"]:
        x = _encoder_layer_ref(x, lp, predict_length)
    return x[:, -predict_length:, :]


if __name__ == "__main__":
    num_layers = 2
    hidden_dim = 32
    input_length = 8
    predict_length = 4
    token_mixer_ks = 3
    feed_forward_ks = 3

    key = jax.random.PRNGKey(0)
    k_params, k_x = jax.random.split(key)
    params, raw_params = init_biar_params(
        k_params, num_layers, hidden_dim, input_length, predict_length,
        token_mixer_ks, feed_forward_ks)

    # Input sequence shorter than input_length -> exercises start_padding path.
    x = jax.random.normal(k_x, (2, 6, hidden_dim), jnp.float32)

    fwd = jax.jit(biar_forward, static_argnums=(2, 3))
    out = jax.block_until_ready(fwd(x, params, input_length, predict_length))

    assert out.shape == (2, predict_length, hidden_dim), out.shape
    assert bool(jnp.all(jnp.isfinite(out)))

    # Check the fused kernels against the unfused pure-JAX reference.
    ref = biar_forward_ref(x, raw_params, input_length, predict_length)
    max_err = float(jnp.max(jnp.abs(out - ref)))
    assert max_err < 2e-3, f"kernel/reference mismatch: max|err|={max_err}"

    print("KERNEL_OK")
</pallas_src>

<mosaic_0001>
module attributes {stable_mosaic.version = 11 : i64} {
  func.func @_mixer_kernel(%arg0: i32, %arg1: memref<16x128xf32, #tpu.memory_space<vmem>>, %arg2: memref<16x48xf32, #tpu.memory_space<vmem>>, %arg3: memref<16x1xf32, #tpu.memory_space<vmem>>, %arg4: memref<16x48xf32, #tpu.memory_space<vmem>>, %arg5: memref<16x1xf32, #tpu.memory_space<vmem>>, %arg6: memref<16x48xf32, #tpu.memory_space<vmem>>, %arg7: memref<16x1xf32, #tpu.memory_space<vmem>>, %arg8: memref<8x48xf32, #tpu.memory_space<vmem>>, %arg9: memref<8x1xf32, #tpu.memory_space<vmem>>, %arg10: memref<16x128xf32, #tpu.memory_space<vmem>>) attributes {dimension_semantics = [#tpu.dimension_semantics<arbitrary>], iteration_bounds = array<i64: 1>, scalar_prefetch = 0 : i64, scratch_operands = 0 : i64, tpu.core_type = #tpu.core_type<tc>, window_params = [{pipeline_mode = #tpu.pipeline_mode<synchronous>, transform_indices = @transform_0, window_bounds = array<i64: 16, 128>}, {pipeline_mode = #tpu.pipeline_mode<synchronous>, transform_indices = @transform_1, window_bounds = array<i64: 16, 48>}, {pipeline_mode = #tpu.pipeline_mode<synchronous>, transform_indices = @transform_2, window_bounds = array<i64: 16, 1>}, {pipeline_mode = #tpu.pipeline_mode<synchronous>, transform_indices = @transform_3, window_bounds = array<i64: 16, 48>}, {pipeline_mode = #tpu.pipeline_mode<synchronous>, transform_indices = @transform_4, window_bounds = array<i64: 16, 1>}, {pipeline_mode = #tpu.pipeline_mode<synchronous>, transform_indices = @transform_5, window_bounds = array<i64: 16, 48>}, {pipeline_mode = #tpu.pipeline_mode<synchronous>, transform_indices = @transform_6, window_bounds = array<i64: 16, 1>}, {pipeline_mode = #tpu.pipeline_mode<synchronous>, transform_indices = @transform_7, window_bounds = array<i64: 8, 48>}, {pipeline_mode = #tpu.pipeline_mode<synchronous>, transform_indices = @transform_8, window_bounds = array<i64: 8, 1>}, {pipeline_mode = #tpu.pipeline_mode<synchronous>, transform_indices = @transform_9, window_bounds = array<i64: 16, 128>}]} {
    %0 = tpu.iota {dimensions = array<i32: 1>} : vector<1x128xi32>
    %c32_i32 = arith.constant 32 : i32
    %c0_i32 = arith.constant 0 : i32
    %1 = arith.cmpi eq, %c32_i32, %c0_i32 : i32
    %c1_i32 = arith.constant 1 : i32
    %2 = arith.select %1, %c1_i32, %c32_i32 : i32
    %3 = vector.broadcast %2 : i32 to vector<1x128xi32>
    %4 = arith.remsi %0, %3 : vector<1x128xi32>
    %c0_i32_0 = arith.constant 0 : i32
    %5 = vector.broadcast %c0_i32_0 : i32 to vector<1x128xi32>
    %6 = arith.cmpi ne, %4, %5 : vector<1x128xi32>
    %c0_i32_1 = arith.constant 0 : i32
    %7 = vector.broadcast %c0_i32_1 : i32 to vector<1x128xi32>
    %8 = arith.cmpi slt, %4, %7 : vector<1x128xi32>
    %c0_i32_2 = arith.constant 0 : i32
    %9 = arith.cmpi slt, %2, %c0_i32_2 : i32
    %10 = vector.broadcast %9 : i1 to vector<1x128xi1>
    %11 = vector.broadcast %10 : vector<1x128xi1> to vector<1x128xi1>
    %12 = arith.xori %8, %11 : vector<1x128xi1>
    %13 = arith.andi %12, %6 : vector<1x128xi1>
    %14 = vector.broadcast %2 : i32 to vector<1x128xi32>
    %15 = arith.addi %4, %14 : vector<1x128xi32>
    %16 = arith.select %13, %15, %4 : vector<1x128xi1>, vector<1x128xi32>
    %c64_i32 = arith.constant 64 : i32
    %17 = vector.broadcast %c64_i32 : i32 to vector<1x128xi32>
    %18 = arith.cmpi slt, %0, %17 : vector<1x128xi32>
    %19 = arith.extui %18 : vector<1x128xi1> to vector<1x128xi32>
    %20 = arith.sitofp %19 : vector<1x128xi32> to vector<1x128xf32>
    %c-1_i32 = arith.constant -1 : i32
    %21 = vector.broadcast %c-1_i32 : i32 to vector<1x128xi32>
    %22 = arith.addi %16, %21 : vector<1x128xi32>
    %c0_i32_3 = arith.constant 0 : i32
    %23 = vector.broadcast %c0_i32_3 : i32 to vector<1x128xi32>
    %24 = arith.cmpi sge, %22, %23 : vector<1x128xi32>
    %c-1_i32_4 = arith.constant -1 : i32
    %25 = vector.broadcast %c-1_i32_4 : i32 to vector<1x128xi32>
    %26 = arith.addi %16, %25 : vector<1x128xi32>
    %c32_i32_5 = arith.constant 32 : i32
    %27 = vector.broadcast %c32_i32_5 : i32 to vector<1x128xi32>
    %28 = arith.cmpi slt, %26, %27 : vector<1x128xi32>
    %29 = arith.andi %24, %28 : vector<1x128xi1>
    %30 = arith.extui %29 : vector<1x128xi1> to vector<1x128xi32>
    %31 = arith.sitofp %30 : vector<1x128xi32> to vector<1x128xf32>
    %c1_i32_6 = arith.constant 1 : i32
    %32 = vector.broadcast %c1_i32_6 : i32 to vector<1x128xi32>
    %33 = arith.addi %16, %32 : vector<1x128xi32>
    %c0_i32_7 = arith.constant 0 : i32
    %34 = vector.broadcast %c0_i32_7 : i32 to vector<1x128xi32>
    %35 = arith.cmpi sge, %33, %34 : vector<1x128xi32>
    %c1_i32_8 = arith.constant 1 : i32
    %36 = vector.broadcast %c1_i32_8 : i32 to vector<1x128xi32>
    %37 = arith.addi %16, %36 : vector<1x128xi32>
    %c32_i32_9 = arith.constant 32 : i32
    %38 = vector.broadcast %c32_i32_9 : i32 to vector<1x128xi32>
    %39 = arith.cmpi slt, %37, %38 : vector<1x128xi32>
    %40 = arith.andi %35, %39 : vector<1x128xi1>
    %41 = arith.extui %40 : vector<1x128xi1> to vector<1x128xi32>
    %42 = arith.sitofp %41 : vector<1x128xi32> to vector<1x128xf32>
    %c0 = arith.constant 0 : index
    %c0_10 = arith.constant 0 : index
    %43 = vector.load %arg1[%c0, %c0_10] : memref<16x128xf32, #tpu.memory_space<vmem>>, vector<16x128xf32>
    %cst = arith.constant dense<0.000000e+00> : vector<16xf32>
    %44 = vector.multi_reduction <add>, %43, %cst [1] : vector<16x128xf32> to vector<16xf32>
    %45 = vector.shape_cast %44 : vector<16xf32> to vector<16x1xf32>
    %46 = arith.mulf %43, %43 : vector<16x128xf32>
    %cst_11 = arith.constant dense<0.000000e+00> : vector<16xf32>
    %47 = vector.multi_reduction <add>, %46, %cst_11 [1] : vector<16x128xf32> to vector<16xf32>
    %48 = vector.shape_cast %47 : vector<16xf32> to vector<16x1xf32>
    %cst_12 = arith.constant 1.562500e-02 : f32
    %49 = vector.broadcast %cst_12 : f32 to vector<16x1xf32>
    %50 = arith.mulf %45, %49 : vector<16x1xf32>
    %cst_13 = arith.constant 1.562500e-02 : f32
    %51 = vector.broadcast %cst_13 : f32 to vector<16x1xf32>
    %52 = arith.mulf %48, %51 : vector<16x1xf32>
    %53 = arith.mulf %50, %50 : vector<16x1xf32>
    %54 = arith.subf %52, %53 : vector<16x1xf32>
    %55 = vector.broadcast %50 : vector<16x1xf32> to vector<16x128xf32>
    %56 = arith.subf %43, %55 : vector<16x128xf32>
    %cst_14 = arith.constant 9.99999974E-6 : f32
    %57 = vector.broadcast %cst_14 : f32 to vector<16x1xf32>
    %58 = arith.addf %54, %57 : vector<16x1xf32>
    %59 = math.rsqrt %58 : vector<16x1xf32>
    %60 = vector.broadcast %59 : vector<16x1xf32> to vector<16x128xf32>
    %61 = arith.mulf %56, %60 : vector<16x128xf32>
    %62 = vector.broadcast %20 : vector<1x128xf32> to vector<16x128xf32>
    %63 = arith.mulf %61, %62 : vector<16x128xf32>
    %c1_i32_15 = arith.constant 1 : i32
    %64 = tpu.dynamic_rotate %63 by %c1_i32_15 dim 1 : vector<16x128xf32>, i32 -> vector<16x128xf32>
    %65 = vector.broadcast %31 : vector<1x128xf32> to vector<16x128xf32>
    %66 = arith.mulf %64, %65 : vector<16x128xf32>
    %c127_i32 = arith.constant 127 : i32
    %67 = tpu.dynamic_rotate %63 by %c127_i32 dim 1 : vector<16x128xf32>, i32 -> vector<16x128xf32>
    %68 = vector.broadcast %42 : vector<1x128xf32> to vector<16x128xf32>
    %69 = arith.mulf %67, %68 : vector<16x128xf32>
    %70 = tpu.concatenate %66, %63, %69 in 0 : vector<16x128xf32>, vector<16x128xf32>, vector<16x128xf32> -> vector<48x128xf32>
    %c0_16 = arith.constant 0 : index
    %c0_17 = arith.constant 0 : index
    %71 = vector.load %arg2[%c0_16, %c0_17] : memref<16x48xf32, #tpu.memory_space<vmem>>, vector<16x48xf32>
    %cst_18 = arith.constant dense<0.000000e+00> : vector<16x128xf32>
    %72 = tpu.matmul %71, %70, %cst_18 {dimension_numbers = #tpu.dot_dimension_numbers<[1], [0], [0], [1], [0, 0, 1, 1], [], []>} : vector<16x48xf32>, vector<48x128xf32>, vector<16x128xf32> -> vector<16x128xf32>
    %c0_19 = arith.constant 0 : index
    %c0_20 = arith.constant 0 : index
    %73 = vector.load %arg3[%c0_19, %c0_20] : memref<16x1xf32, #tpu.memory_space<vmem>>, vector<16x1xf32>
    %74 = vector.broadcast %73 : vector<16x1xf32> to vector<16x128xf32>
    %75 = arith.addf %72, %74 : vector<16x128xf32>
    %cst_21 = arith.constant 0.000000e+00 : f32
    %76 = vector.broadcast %cst_21 : f32 to vector<16x128xf32>
    %77 = arith.maximumf %75, %76 : vector<16x128xf32>
    %78 = vector.broadcast %20 : vector<1x128xf32> to vector<16x128xf32>
    %79 = arith.mulf %77, %78 : vector<16x128xf32>
    %c1_i32_22 = arith.constant 1 : i32
    %80 = tpu.dynamic_rotate %79 by %c1_i32_22 dim 1 : vector<16x128xf32>, i32 -> vector<16x128xf32>
    %81 = vector.broadcast %31 : vector<1x128xf32> to vector<16x128xf32>
    %82 = arith.mulf %80, %81 : vector<16x128xf32>
    %c127_i32_23 = arith.constant 127 : i32
    %83 = tpu.dynamic_rotate %79 by %c127_i32_23 dim 1 : vector<16x128xf32>, i32 -> vector<16x128xf32>
    %84 = vector.broadcast %42 : vector<1x128xf32> to vector<16x128xf32>
    %85 = arith.mulf %83, %84 : vector<16x128xf32>
    %86 = tpu.concatenate %82, %79, %85 in 0 : vector<16x128xf32>, vector<16x128xf32>, vector<16x128xf32> -> vector<48x128xf32>
    %c0_24 = arith.constant 0 : index
    %c0_25 = arith.constant 0 : index
    %87 = vector.load %arg4[%c0_24, %c0_25] : memref<16x48xf32, #tpu.memory_space<vmem>>, vector<16x48xf32>
    %cst_26 = arith.constant dense<0.000000e+00> : vector<16x128xf32>
    %88 = tpu.matmul %87, %86, %cst_26 {dimension_numbers = #tpu.dot_dimension_numbers<[1], [0], [0], [1], [0, 0, 1, 1], [], []>} : vector<16x48xf32>, vector<48x128xf32>, vector<16x128xf32> -> vector<16x128xf32>
    %c0_27 = arith.constant 0 : index
    %c0_28 = arith.constant 0 : index
    %89 = vector.load %arg5[%c0_27, %c0_28] : memref<16x1xf32, #tpu.memory_space<vmem>>, vector<16x1xf32>
    %90 = vector.broadcast %89 : vector<16x1xf32> to vector<16x128xf32>
    %91 = arith.addf %88, %90 : vector<16x128xf32>
    %cst_29 = arith.constant 0.000000e+00 : f32
    %92 = vector.broadcast %cst_29 : f32 to vector<16x128xf32>
    %93 = arith.maximumf %91, %92 : vector<16x128xf32>
    %94 = vector.broadcast %20 : vector<1x128xf32> to vector<16x128xf32>
    %95 = arith.mulf %93, %94 : vector<16x128xf32>
    %96 = arith.addf %95, %43 : vector<16x128xf32>
    %cst_30 = arith.constant dense<0.000000e+00> : vector<16xf32>
    %97 = vector.multi_reduction <add>, %96, %cst_30 [1] : vector<16x128xf32> to vector<16xf32>
    %98 = vector.shape_cast %97 : vector<16xf32> to vector<16x1xf32>
    %99 = arith.mulf %96, %96 : vector<16x128xf32>
    %cst_31 = arith.constant dense<0.000000e+00> : vector<16xf32>
    %100 = vector.multi_reduction <add>, %99, %cst_31 [1] : vector<16x128xf32> to vector<16xf32>
    %101 = vector.shape_cast %100 : vector<16xf32> to vector<16x1xf32>
    %cst_32 = arith.constant 1.562500e-02 : f32
    %102 = vector.broadcast %cst_32 : f32 to vector<16x1xf32>
    %103 = arith.mulf %98, %102 : vector<16x1xf32>
    %cst_33 = arith.constant 1.562500e-02 : f32
    %104 = vector.broadcast %cst_33 : f32 to vector<16x1xf32>
    %105 = arith.mulf %101, %104 : vector<16x1xf32>
    %106 = arith.mulf %103, %103 : vector<16x1xf32>
    %107 = arith.subf %105, %106 : vector<16x1xf32>
    %108 = vector.broadcast %103 : vector<16x1xf32> to vector<16x128xf32>
    %109 = arith.subf %96, %108 : vector<16x128xf32>
    %cst_34 = arith.constant 9.99999974E-6 : f32
    %110 = vector.broadcast %cst_34 : f32 to vector<16x1xf32>
    %111 = arith.addf %107, %110 : vector<16x1xf32>
    %112 = math.rsqrt %111 : vector<16x1xf32>
    %113 = vector.broadcast %112 : vector<16x1xf32> to vector<16x128xf32>
    %114 = arith.mulf %109, %113 : vector<16x128xf32>
    %115 = vector.broadcast %20 : vector<1x128xf32> to vector<16x128xf32>
    %116 = arith.mulf %114, %115 : vector<16x128xf32>
    %c1_i32_35 = arith.constant 1 : i32
    %117 = tpu.dynamic_rotate %116 by %c1_i32_35 dim 1 : vector<16x128xf32>, i32 -> vector<16x128xf32>
    %118 = vector.broadcast %31 : vector<1x128xf32> to vector<16x128xf32>
    %119 = arith.mulf %117, %118 : vector<16x128xf32>
    %c127_i32_36 = arith.constant 127 : i32
    %120 = tpu.dynamic_rotate %116 by %c127_i32_36 dim 1 : vector<16x128xf32>, i32 -> vector<16x128xf32>
    %121 = vector.broadcast %42 : vector<1x128xf32> to vector<16x128xf32>
    %122 = arith.mulf %120, %121 : vector<16x128xf32>
    %123 = tpu.concatenate %119, %116, %122 in 0 : vector<16x128xf32>, vector<16x128xf32>, vector<16x128xf32> -> vector<48x128xf32>
    %c0_37 = arith.constant 0 : index
    %c0_38 = arith.constant 0 : index
    %124 = vector.load %arg6[%c0_37, %c0_38] : memref<16x48xf32, #tpu.memory_space<vmem>>, vector<16x48xf32>
    %cst_39 = arith.constant dense<0.000000e+00> : vector<16x128xf32>
    %125 = tpu.matmul %124, %123, %cst_39 {dimension_numbers = #tpu.dot_dimension_numbers<[1], [0], [0], [1], [0, 0, 1, 1], [], []>} : vector<16x48xf32>, vector<48x128xf32>, vector<16x128xf32> -> vector<16x128xf32>
    %c0_40 = arith.constant 0 : index
    %c0_41 = arith.constant 0 : index
    %126 = vector.load %arg7[%c0_40, %c0_41] : memref<16x1xf32, #tpu.memory_space<vmem>>, vector<16x1xf32>
    %127 = vector.broadcast %126 : vector<16x1xf32> to vector<16x128xf32>
    %128 = arith.addf %125, %127 : vector<16x128xf32>
    %cst_42 = arith.constant 0.000000e+00 : f32
    %129 = vector.broadcast %cst_42 : f32 to vector<16x128xf32>
    %130 = arith.maximumf %128, %129 : vector<16x128xf32>
    %131 = vector.broadcast %20 : vector<1x128xf32> to vector<16x128xf32>
    %132 = arith.mulf %130, %131 : vector<16x128xf32>
    %c1_i32_43 = arith.constant 1 : i32
    %133 = tpu.dynamic_rotate %132 by %c1_i32_43 dim 1 : vector<16x128xf32>, i32 -> vector<16x128xf32>
    %134 = vector.broadcast %31 : vector<1x128xf32> to vector<16x128xf32>
    %135 = arith.mulf %133, %134 : vector<16x128xf32>
    %c127_i32_44 = arith.constant 127 : i32
    %136 = tpu.dynamic_rotate %132 by %c127_i32_44 dim 1 : vector<16x128xf32>, i32 -> vector<16x128xf32>
    %137 = vector.broadcast %42 : vector<1x128xf32> to vector<16x128xf32>
    %138 = arith.mulf %136, %137 : vector<16x128xf32>
    %139 = tpu.concatenate %135, %132, %138 in 0 : vector<16x128xf32>, vector<16x128xf32>, vector<16x128xf32> -> vector<48x128xf32>
    %c0_45 = arith.constant 0 : index
    %c0_46 = arith.constant 0 : index
    %140 = vector.load %arg8[%c0_45, %c0_46] : memref<8x48xf32, #tpu.memory_space<vmem>>, vector<8x48xf32>
    %cst_47 = arith.constant dense<0.000000e+00> : vector<8x128xf32>
    %141 = tpu.matmul %140, %139, %cst_47 {dimension_numbers = #tpu.dot_dimension_numbers<[1], [0], [0], [1], [0, 0, 1, 1], [], []>} : vector<8x48xf32>, vector<48x128xf32>, vector<8x128xf32> -> vector<8x128xf32>
    %c0_48 = arith.constant 0 : index
    %c0_49 = arith.constant 0 : index
    %142 = vector.load %arg9[%c0_48, %c0_49] : memref<8x1xf32, #tpu.memory_space<vmem>>, vector<8x1xf32>
    %143 = vector.broadcast %142 : vector<8x1xf32> to vector<8x128xf32>
    %144 = arith.addf %141, %143 : vector<8x128xf32>
    %cst_50 = arith.constant 0.000000e+00 : f32
    %145 = vector.broadcast %cst_50 : f32 to vector<8x128xf32>
    %146 = arith.maximumf %144, %145 : vector<8x128xf32>
    %147 = vector.broadcast %20 : vector<1x128xf32> to vector<8x128xf32>
    %148 = arith.mulf %146, %147 : vector<8x128xf32>
    %149 = vector.extract_strided_slice %43 {offsets = [0, 0], sizes = [8, 128], strides = [1, 1]} : vector<16x128xf32> to vector<8x128xf32>
    %150 = vector.extract_strided_slice %148 {offsets = [0, 0], sizes = [4, 128], strides = [1, 1]} : vector<8x128xf32> to vector<4x128xf32>
    %cst_51 = arith.constant 0.000000e+00 : f32
    %151 = vector.broadcast %cst_51 : f32 to vector<4x128xf32>
    %152 = tpu.concatenate %149, %150, %151 in 0 : vector<8x128xf32>, vector<4x128xf32>, vector<4x128xf32> -> vector<16x128xf32>
    %153 = arith.addf %43, %152 : vector<16x128xf32>
    %c0_52 = arith.constant 0 : index
    %c0_53 = arith.constant 0 : index
    %154 = vector.load %arg10[%c0_52, %c0_53] : memref<16x128xf32, #tpu.memory_space<vmem>>, vector<16x128xf32>
    tpu.vector_store %arg10[%c0_52, %c0_53], %153 {strides = array<i32>} : memref<16x128xf32, #tpu.memory_space<vmem>>, vector<16x128xf32>,
    return
  }
  func.func @transform_0(%arg0: i32) -> (i32, i32) {
    %c0_i32 = arith.constant 0 : i32
    %c0_i32_0 = arith.constant 0 : i32
    %c0_i32_1 = arith.constant 0 : i32
    return %c0_i32, %c0_i32_0 : i32, i32
  }
  func.func @transform_1(%arg0: i32) -> (i32, i32) {
    %c0_i32 = arith.constant 0 : i32
    %c0_i32_0 = arith.constant 0 : i32
    %c0_i32_1 = arith.constant 0 : i32
    return %c0_i32, %c0_i32_0 : i32, i32
  }
  func.func @transform_2(%arg0: i32) -> (i32, i32) {
    %c0_i32 = arith.constant 0 : i32
    %c0_i32_0 = arith.constant 0 : i32
    %c0_i32_1 = arith.constant 0 : i32
    return %c0_i32, %c0_i32_0 : i32, i32
  }
  func.func @transform_3(%arg0: i32) -> (i32, i32) {
    %c0_i32 = arith.constant 0 : i32
    %c0_i32_0 = arith.constant 0 : i32
    %c0_i32_1 = arith.constant 0 : i32
    return %c0_i32, %c0_i32_0 : i32, i32
  }
  func.func @transform_4(%arg0: i32) -> (i32, i32) {
    %c0_i32 = arith.constant 0 : i32
    %c0_i32_0 = arith.constant 0 : i32
    %c0_i32_1 = arith.constant 0 : i32
    return %c0_i32, %c0_i32_0 : i32, i32
  }
  func.func @transform_5(%arg0: i32) -> (i32, i32) {
    %c0_i32 = arith.constant 0 : i32
    %c0_i32_0 = arith.constant 0 : i32
    %c0_i32_1 = arith.constant 0 : i32
    return %c0_i32, %c0_i32_0 : i32, i32
  }
  func.func @transform_6(%arg0: i32) -> (i32, i32) {
    %c0_i32 = arith.constant 0 : i32
    %c0_i32_0 = arith.constant 0 : i32
    %c0_i32_1 = arith.constant 0 : i32
    return %c0_i32, %c0_i32_0 : i32, i32
  }
  func.func @transform_7(%arg0: i32) -> (i32, i32) {
    %c0_i32 = arith.constant 0 : i32
    %c0_i32_0 = arith.constant 0 : i32
    %c0_i32_1 = arith.constant 0 : i32
    return %c0_i32, %c0_i32_0 : i32, i32
  }
  func.func @transform_8(%arg0: i32) -> (i32, i32) {
    %c0_i32 = arith.constant 0 : i32
    %c0_i32_0 = arith.constant 0 : i32
    %c0_i32_1 = arith.constant 0 : i32
    return %c0_i32, %c0_i32_0 : i32, i32
  }
  func.func @transform_9(%arg0: i32) -> (i32, i32) {
    %c0_i32 = arith.constant 0 : i32
    %c0_i32_0 = arith.constant 0 : i32
    %c0_i32_1 = arith.constant 0 : i32
    return %c0_i32, %c0_i32_0 : i32, i32
  }
}

module attributes {stable_mosaic.version = 11 : i64} {
  func.func @_mixer_kernel(%arg0: i32, %arg1: memref<32x128xf32, #tpu.memory_space<vmem>>, %arg2: memref<32x96xf32, #tpu.memory_space<vmem>>, %arg3: memref<32x1xf32, #tpu.memory_space<vmem>>, %arg4: memref<32x96xf32, #tpu.memory_space<vmem>>, %arg5: memref<32x1xf32, #tpu.memory_space<vmem>>, %arg6: memref<32x96xf32, #tpu.memory_space<vmem>>, %arg7: memref<32x1xf32, #tpu.memory_space<vmem>>, %arg8: memref<32x96xf32, #tpu.memory_space<vmem>>, %arg9: memref<32x1xf32, #tpu.memory_space<vmem>>, %arg10: memref<32x128xf32, #tpu.memory_space<vmem>>) attributes {dimension_semantics = [#tpu.dimension_semantics<arbitrary>], iteration_bounds = array<i64: 1>, scalar_prefetch = 0 : i64, scratch_operands = 0 : i64, tpu.core_type = #tpu.core_type<tc>, window_params = [{pipeline_mode = #tpu.pipeline_mode<synchronous>, transform_indices = @transform_0, window_bounds = array<i64: 32, 128>}, {pipeline_mode = #tpu.pipeline_mode<synchronous>, transform_indices = @transform_1, window_bounds = array<i64: 32, 96>}, {pipeline_mode = #tpu.pipeline_mode<synchronous>, transform_indices = @transform_2, window_bounds = array<i64: 32, 1>}, {pipeline_mode = #tpu.pipeline_mode<synchronous>, transform_indices = @transform_3, window_bounds = array<i64: 32, 96>}, {pipeline_mode = #tpu.pipeline_mode<synchronous>, transform_indices = @transform_4, window_bounds = array<i64: 32, 1>}, {pipeline_mode = #tpu.pipeline_mode<synchronous>, transform_indices = @transform_5, window_bounds = array<i64: 32, 96>}, {pipeline_mode = #tpu.pipeline_mode<synchronous>, transform_indices = @transform_6, window_bounds = array<i64: 32, 1>}, {pipeline_mode = #tpu.pipeline_mode<synchronous>, transform_indices = @transform_7, window_bounds = array<i64: 32, 96>}, {pipeline_mode = #tpu.pipeline_mode<synchronous>, transform_indices = @transform_8, window_bounds = array<i64: 32, 1>}, {pipeline_mode = #tpu.pipeline_mode<synchronous>, transform_indices = @transform_9, window_bounds = array<i64: 32, 128>}]} {
    %0 = tpu.iota {dimensions = array<i32: 1>} : vector<1x128xi32>
    %c12_i32 = arith.constant 12 : i32
    %c0_i32 = arith.constant 0 : i32
    %1 = arith.cmpi eq, %c12_i32, %c0_i32 : i32
    %c1_i32 = arith.constant 1 : i32
    %2 = arith.select %1, %c1_i32, %c12_i32 : i32
    %3 = vector.broadcast %2 : i32 to vector<1x128xi32>
    %4 = arith.remsi %0, %3 : vector<1x128xi32>
    %c0_i32_0 = arith.constant 0 : i32
    %5 = vector.broadcast %c0_i32_0 : i32 to vector<1x128xi32>
    %6 = arith.cmpi ne, %4, %5 : vector<1x128xi32>
    %c0_i32_1 = arith.constant 0 : i32
    %7 = vector.broadcast %c0_i32_1 : i32 to vector<1x128xi32>
    %8 = arith.cmpi slt, %4, %7 : vector<1x128xi32>
    %c0_i32_2 = arith.constant 0 : i32
    %9 = arith.cmpi slt, %2, %c0_i32_2 : i32
    %10 = vector.broadcast %9 : i1 to vector<1x128xi1>
    %11 = vector.broadcast %10 : vector<1x128xi1> to vector<1x128xi1>
    %12 = arith.xori %8, %11 : vector<1x128xi1>
    %13 = arith.andi %12, %6 : vector<1x128xi1>
    %14 = vector.broadcast %2 : i32 to vector<1x128xi32>
    %15 = arith.addi %4, %14 : vector<1x128xi32>
    %16 = arith.select %13, %15, %4 : vector<1x128xi1>, vector<1x128xi32>
    %c24_i32 = arith.constant 24 : i32
    %17 = vector.broadcast %c24_i32 : i32 to vector<1x128xi32>
    %18 = arith.cmpi slt, %0, %17 : vector<1x128xi32>
    %19 = arith.extui %18 : vector<1x128xi1> to vector<1x128xi32>
    %20 = arith.sitofp %19 : vector<1x128xi32> to vector<1x128xf32>
    %c-1_i32 = arith.constant -1 : i32
    %21 = vector.broadcast %c-1_i32 : i32 to vector<1x128xi32>
    %22 = arith.addi %16, %21 : vector<1x128xi32>
    %c0_i32_3 = arith.constant 0 : i32
    %23 = vector.broadcast %c0_i32_3 : i32 to vector<1x128xi32>
    %24 = arith.cmpi sge, %22, %23 : vector<1x128xi32>
    %c-1_i32_4 = arith.constant -1 : i32
    %25 = vector.broadcast %c-1_i32_4 : i32 to vector<1x128xi32>
    %26 = arith.addi %16, %25 : vector<1x128xi32>
    %c12_i32_5 = arith.constant 12 : i32
    %27 = vector.broadcast %c12_i32_5 : i32 to vector<1x128xi32>
    %28 = arith.cmpi slt, %26, %27 : vector<1x128xi32>
    %29 = arith.andi %24, %28 : vector<1x128xi1>
    %30 = arith.extui %29 : vector<1x128xi1> to vector<1x128xi32>
    %31 = arith.sitofp %30 : vector<1x128xi32> to vector<1x128xf32>
    %c1_i32_6 = arith.constant 1 : i32
    %32 = vector.broadcast %c1_i32_6 : i32 to vector<1x128xi32>
    %33 = arith.addi %16, %32 : vector<1x128xi32>
    %c0_i32_7 = arith.constant 0 : i32
    %34 = vector.broadcast %c0_i32_7 : i32 to vector<1x128xi32>
    %35 = arith.cmpi sge, %33, %34 : vector<1x128xi32>
    %c1_i32_8 = arith.constant 1 : i32
    %36 = vector.broadcast %c1_i32_8 : i32 to vector<1x128xi32>
    %37 = arith.addi %16, %36 : vector<1x128xi32>
    %c12_i32_9 = arith.constant 12 : i32
    %38 = vector.broadcast %c12_i32_9 : i32 to vector<1x128xi32>
    %39 = arith.cmpi slt, %37, %38 : vector<1x128xi32>
    %40 = arith.andi %35, %39 : vector<1x128xi1>
    %41 = arith.extui %40 : vector<1x128xi1> to vector<1x128xi32>
    %42 = arith.sitofp %41 : vector<1x128xi32> to vector<1x128xf32>
    %c0 = arith.constant 0 : index
    %c0_10 = arith.constant 0 : index
    %43 = vector.load %arg1[%c0, %c0_10] : memref<32x128xf32, #tpu.memory_space<vmem>>, vector<32x128xf32>
    %cst = arith.constant dense<0.000000e+00> : vector<32xf32>
    %44 = vector.multi_reduction <add>, %43, %cst [1] : vector<32x128xf32> to vector<32xf32>
    %45 = vector.shape_cast %44 : vector<32xf32> to vector<32x1xf32>
    %46 = arith.mulf %43, %43 : vector<32x128xf32>
    %cst_11 = arith.constant dense<0.000000e+00> : vector<32xf32>
    %47 = vector.multi_reduction <add>, %46, %cst_11 [1] : vector<32x128xf32> to vector<32xf32>
    %48 = vector.shape_cast %47 : vector<32xf32> to vector<32x1xf32>
    %cst_12 = arith.constant 0.0416666679 : f32
    %49 = vector.broadcast %cst_12 : f32 to vector<32x1xf32>
    %50 = arith.mulf %45, %49 : vector<32x1xf32>
    %cst_13 = arith.constant 0.0416666679 : f32
    %51 = vector.broadcast %cst_13 : f32 to vector<32x1xf32>
    %52 = arith.mulf %48, %51 : vector<32x1xf32>
    %53 = arith.mulf %50, %50 : vector<32x1xf32>
    %54 = arith.subf %52, %53 : vector<32x1xf32>
    %55 = vector.broadcast %50 : vector<32x1xf32> to vector<32x128xf32>
    %56 = arith.subf %43, %55 : vector<32x128xf32>
    %cst_14 = arith.constant 9.99999974E-6 : f32
    %57 = vector.broadcast %cst_14 : f32 to vector<32x1xf32>
    %58 = arith.addf %54, %57 : vector<32x1xf32>
    %59 = math.rsqrt %58 : vector<32x1xf32>
    %60 = vector.broadcast %59 : vector<32x1xf32> to vector<32x128xf32>
    %61 = arith.mulf %56, %60 : vector<32x128xf32>
    %62 = vector.broadcast %20 : vector<1x128xf32> to vector<32x128xf32>
    %63 = arith.mulf %61, %62 : vector<32x128xf32>
    %c1_i32_15 = arith.constant 1 : i32
    %64 = tpu.dynamic_rotate %63 by %c1_i32_15 dim 1 : vector<32x128xf32>, i32 -> vector<32x128xf32>
    %65 = vector.broadcast %31 : vector<1x128xf32> to vector<32x128xf32>
    %66 = arith.mulf %64, %65 : vector<32x128xf32>
    %c127_i32 = arith.constant 127 : i32
    %67 = tpu.dynamic_rotate %63 by %c127_i32 dim 1 : vector<32x128xf32>, i32 -> vector<32x128xf32>
    %68 = vector.broadcast %42 : vector<1x128xf32> to vector<32x128xf32>
    %69 = arith.mulf %67, %68 : vector<32x128xf32>
    %70 = tpu.concatenate %66, %63, %69 in 0 : vector<32x128xf32>, vector<32x128xf32>, vector<32x128xf32> -> vector<96x128xf32>
    %c0_16 = arith.constant 0 : index
    %c0_17 = arith.constant 0 : index
    %71 = vector.load %arg2[%c0_16, %c0_17] : memref<32x96xf32, #tpu.memory_space<vmem>>, vector<32x96xf32>
    %cst_18 = arith.constant dense<0.000000e+00> : vector<32x128xf32>
    %72 = tpu.matmul %71, %70, %cst_18 {dimension_numbers = #tpu.dot_dimension_numbers<[1], [0], [0], [1], [0, 0, 1, 1], [], []>} : vector<32x96xf32>, vector<96x128xf32>, vector<32x128xf32> -> vector<32x128xf32>
    %c0_19 = arith.constant 0 : index
    %c0_20 = arith.constant 0 : index
    %73 = vector.load %arg3[%c0_19, %c0_20] : memref<32x1xf32, #tpu.memory_space<vmem>>, vector<32x1xf32>
    %74 = vector.broadcast %73 : vector<32x1xf32> to vector<32x128xf32>
    %75 = arith.addf %72, %74 : vector<32x128xf32>
    %cst_21 = arith.constant 0.000000e+00 : f32
    %76 = vector.broadcast %cst_21 : f32 to vector<32x128xf32>
    %77 = arith.maximumf %75, %76 : vector<32x128xf32>
    %78 = vector.broadcast %20 : vector<1x128xf32> to vector<32x128xf32>
    %79 = arith.mulf %77, %78 : vector<32x128xf32>
    %c1_i32_22 = arith.constant 1 : i32
    %80 = tpu.dynamic_rotate %79 by %c1_i32_22 dim 1 : vector<32x128xf32>, i32 -> vector<32x128xf32>
    %81 = vector.broadcast %31 : vector<1x128xf32> to vector<32x128xf32>
    %82 = arith.mulf %80, %81 : vector<32x128xf32>
    %c127_i32_23 = arith.constant 127 : i32
    %83 = tpu.dynamic_rotate %79 by %c127_i32_23 dim 1 : vector<32x128xf32>, i32 -> vector<32x128xf32>
    %84 = vector.broadcast %42 : vector<1x128xf32> to vector<32x128xf32>
    %85 = arith.mulf %83, %84 : vector<32x128xf32>
    %86 = tpu.concatenate %82, %79, %85 in 0 : vector<32x128xf32>, vector<32x128xf32>, vector<32x128xf32> -> vector<96x128xf32>
    %c0_24 = arith.constant 0 : index
    %c0_25 = arith.constant 0 : index
    %87 = vector.load %arg4[%c0_24, %c0_25] : memref<32x96xf32, #tpu.memory_space<vmem>>, vector<32x96xf32>
    %cst_26 = arith.constant dense<0.000000e+00> : vector<32x128xf32>
    %88 = tpu.matmul %87, %86, %cst_26 {dimension_numbers = #tpu.dot_dimension_numbers<[1], [0], [0], [1], [0, 0, 1, 1], [], []>} : vector<32x96xf32>, vector<96x128xf32>, vector<32x128xf32> -> vector<32x128xf32>
    %c0_27 = arith.constant 0 : index
    %c0_28 = arith.constant 0 : index
    %89 = vector.load %arg5[%c0_27, %c0_28] : memref<32x1xf32, #tpu.memory_space<vmem>>, vector<32x1xf32>
    %90 = vector.broadcast %89 : vector<32x1xf32> to vector<32x128xf32>
    %91 = arith.addf %88, %90 : vector<32x128xf32>
    %cst_29 = arith.constant 0.000000e+00 : f32
    %92 = vector.broadcast %cst_29 : f32 to vector<32x128xf32>
    %93 = arith.maximumf %91, %92 : vector<32x128xf32>
    %94 = vector.broadcast %20 : vector<1x128xf32> to vector<32x128xf32>
    %95 = arith.mulf %93, %94 : vector<32x128xf32>
    %96 = arith.addf %95, %43 : vector<32x128xf32>
    %cst_30 = arith.constant dense<0.000000e+00> : vector<32xf32>
    %97 = vector.multi_reduction <add>, %96, %cst_30 [1] : vector<32x128xf32> to vector<32xf32>
    %98 = vector.shape_cast %97 : vector<32xf32> to vector<32x1xf32>
    %99 = arith.mulf %96, %96 : vector<32x128xf32>
    %cst_31 = arith.constant dense<0.000000e+00> : vector<32xf32>
    %100 = vector.multi_reduction <add>, %99, %cst_31 [1] : vector<32x128xf32> to vector<32xf32>
    %101 = vector.shape_cast %100 : vector<32xf32> to vector<32x1xf32>
    %cst_32 = arith.constant 0.0416666679 : f32
    %102 = vector.broadcast %cst_32 : f32 to vector<32x1xf32>
    %103 = arith.mulf %98, %102 : vector<32x1xf32>
    %cst_33 = arith.constant 0.0416666679 : f32
    %104 = vector.broadcast %cst_33 : f32 to vector<32x1xf32>
    %105 = arith.mulf %101, %104 : vector<32x1xf32>
    %106 = arith.mulf %103, %103 : vector<32x1xf32>
    %107 = arith.subf %105, %106 : vector<32x1xf32>
    %108 = vector.broadcast %103 : vector<32x1xf32> to vector<32x128xf32>
    %109 = arith.subf %96, %108 : vector<32x128xf32>
    %cst_34 = arith.constant 9.99999974E-6 : f32
    %110 = vector.broadcast %cst_34 : f32 to vector<32x1xf32>
    %111 = arith.addf %107, %110 : vector<32x1xf32>
    %112 = math.rsqrt %111 : vector<32x1xf32>
    %113 = vector.broadcast %112 : vector<32x1xf32> to vector<32x128xf32>
    %114 = arith.mulf %109, %113 : vector<32x128xf32>
    %115 = vector.broadcast %20 : vector<1x128xf32> to vector<32x128xf32>
    %116 = arith.mulf %114, %115 : vector<32x128xf32>
    %c1_i32_35 = arith.constant 1 : i32
    %117 = tpu.dynamic_rotate %116 by %c1_i32_35 dim 1 : vector<32x128xf32>, i32 -> vector<32x128xf32>
    %118 = vector.broadcast %31 : vector<1x128xf32> to vector<32x128xf32>
    %119 = arith.mulf %117, %118 : vector<32x128xf32>
    %c127_i32_36 = arith.constant 127 : i32
    %120 = tpu.dynamic_rotate %116 by %c127_i32_36 dim 1 : vector<32x128xf32>, i32 -> vector<32x128xf32>
    %121 = vector.broadcast %42 : vector<1x128xf32> to vector<32x128xf32>
    %122 = arith.mulf %120, %121 : vector<32x128xf32>
    %123 = tpu.concatenate %119, %116, %122 in 0 : vector<32x128xf32>, vector<32x128xf32>, vector<32x128xf32> -> vector<96x128xf32>
    %c0_37 = arith.constant 0 : index
    %c0_38 = arith.constant 0 : index
    %124 = vector.load %arg6[%c0_37, %c0_38] : memref<32x96xf32, #tpu.memory_space<vmem>>, vector<32x96xf32>
    %cst_39 = arith.constant dense<0.000000e+00> : vector<32x128xf32>
    %125 = tpu.matmul %124, %123, %cst_39 {dimension_numbers = #tpu.dot_dimension_numbers<[1], [0], [0], [1], [0, 0, 1, 1], [], []>} : vector<32x96xf32>, vector<96x128xf32>, vector<32x128xf32> -> vector<32x128xf32>
    %c0_40 = arith.constant 0 : index
    %c0_41 = arith.constant 0 : index
    %126 = vector.load %arg7[%c0_40, %c0_41] : memref<32x1xf32, #tpu.memory_space<vmem>>, vector<32x1xf32>
    %127 = vector.broadcast %126 : vector<32x1xf32> to vector<32x128xf32>
    %128 = arith.addf %125, %127 : vector<32x128xf32>
    %cst_42 = arith.constant 0.000000e+00 : f32
    %129 = vector.broadcast %cst_42 : f32 to vector<32x128xf32>
    %130 = arith.maximumf %128, %129 : vector<32x128xf32>
    %131 = vector.broadcast %20 : vector<1x128xf32> to vector<32x128xf32>
    %132 = arith.mulf %130, %131 : vector<32x128xf32>
    %c1_i32_43 = arith.constant 1 : i32
    %133 = tpu.dynamic_rotate %132 by %c1_i32_43 dim 1 : vector<32x128xf32>, i32 -> vector<32x128xf32>
    %134 = vector.broadcast %31 : vector<1x128xf32> to vector<32x128xf32>
    %135 = arith.mulf %133, %134 : vector<32x128xf32>
    %c127_i32_44 = arith.constant 127 : i32
    %136 = tpu.dynamic_rotate %132 by %c127_i32_44 dim 1 : vector<32x128xf32>, i32 -> vector<32x128xf32>
    %137 = vector.broadcast %42 : vector<1x128xf32> to vector<32x128xf32>
    %138 = arith.mulf %136, %137 : vector<32x128xf32>
    %139 = tpu.concatenate %135, %132, %138 in 0 : vector<32x128xf32>, vector<32x128xf32>, vector<32x128xf32> -> vector<96x128xf32>
    %c0_45 = arith.constant 0 : index
    %c0_46 = arith.constant 0 : index
    %140 = vector.load %arg8[%c0_45, %c0_46] : memref<32x96xf32, #tpu.memory_space<vmem>>, vector<32x96xf32>
    %cst_47 = arith.constant dense<0.000000e+00> : vector<32x128xf32>
    %141 = tpu.matmul %140, %139, %cst_47 {dimension_numbers = #tpu.dot_dimension_numbers<[1], [0], [0], [1], [0, 0, 1, 1], [], []>} : vector<32x96xf32>, vector<96x128xf32>, vector<32x128xf32> -> vector<32x128xf32>
    %c0_48 = arith.constant 0 : index
    %c0_49 = arith.constant 0 : index
    %142 = vector.load %arg9[%c0_48, %c0_49] : memref<32x1xf32, #tpu.memory_space<vmem>>, vector<32x1xf32>
    %143 = vector.broadcast %142 : vector<32x1xf32> to vector<32x128xf32>
    %144 = arith.addf %141, %143 : vector<32x128xf32>
    %cst_50 = arith.constant 0.000000e+00 : f32
    %145 = vector.broadcast %cst_50 : f32 to vector<32x128xf32>
    %146 = arith.maximumf %144, %145 : vector<32x128xf32>
    %147 = vector.broadcast %20 : vector<1x128xf32> to vector<32x128xf32>
    %148 = arith.mulf %146, %147 : vector<32x128xf32>
    %149 = arith.addf %148, %43 : vector<32x128xf32>
    %c0_51 = arith.constant 0 : index
    %c0_52 = arith.constant 0 : index
    %150 = vector.load %arg10[%c0_51, %c0_52] : memref<32x128xf32, #tpu.memory_space<vmem>>, vector<32x128xf32>
    tpu.vector_store %arg10[%c0_51, %c0_52], %149 {strides = array<i32>} : memref<32x128xf32, #tpu.memory_space<vmem>>, vector<32x128xf32>,
    return
  }
  func.func @transform_0(%arg0: i32) -> (i32, i32) {
    %c0_i32 = arith.constant 0 : i32
    %c0_i32_0 = arith.constant 0 : i32
    %c0_i32_1 = arith.constant 0 : i32
    return %c0_i32, %c0_i32_0 : i32, i32
  }
  func.func @transform_1(%arg0: i32) -> (i32, i32) {
    %c0_i32 = arith.constant 0 : i32
    %c0_i32_0 = arith.constant 0 : i32
    %c0_i32_1 = arith.constant 0 : i32
    return %c0_i32, %c0_i32_0 : i32, i32
  }
  func.func @transform_2(%arg0: i32) -> (i32, i32) {
    %c0_i32 = arith.constant 0 : i32
    %c0_i32_0 = arith.constant 0 : i32
    %c0_i32_1 = arith.constant 0 : i32
    return %c0_i32, %c0_i32_0 : i32, i32
  }
  func.func @transform_3(%arg0: i32) -> (i32, i32) {
    %c0_i32 = arith.constant 0 : i32
    %c0_i32_0 = arith.constant 0 : i32
    %c0_i32_1 = arith.constant 0 : i32
    return %c0_i32, %c0_i32_0 : i32, i32
  }
  func.func @transform_4(%arg0: i32) -> (i32, i32) {
    %c0_i32 = arith.constant 0 : i32
    %c0_i32_0 = arith.constant 0 : i32
    %c0_i32_1 = arith.constant 0 : i32
    return %c0_i32, %c0_i32_0 : i32, i32
  }
  func.func @transform_5(%arg0: i32) -> (i32, i32) {
    %c0_i32 = arith.constant 0 : i32
    %c0_i32_0 = arith.constant 0 : i32
    %c0_i32_1 = arith.constant 0 : i32
    return %c0_i32, %c0_i32_0 : i32, i32
  }
  func.func @transform_6(%arg0: i32) -> (i32, i32) {
    %c0_i32 = arith.constant 0 : i32
    %c0_i32_0 = arith.constant 0 : i32
    %c0_i32_1 = arith.constant 0 : i32
    return %c0_i32, %c0_i32_0 : i32, i32
  }
  func.func @transform_7(%arg0: i32) -> (i32, i32) {
    %c0_i32 = arith.constant 0 : i32
    %c0_i32_0 = arith.constant 0 : i32
    %c0_i32_1 = arith.constant 0 : i32
    return %c0_i32, %c0_i32_0 : i32, i32
  }
  func.func @transform_8(%arg0: i32) -> (i32, i32) {
    %c0_i32 = arith.constant 0 : i32
    %c0_i32_0 = arith.constant 0 : i32
    %c0_i32_1 = arith.constant 0 : i32
    return %c0_i32, %c0_i32_0 : i32, i32
  }
  func.func @transform_9(%arg0: i32) -> (i32, i32) {
    %c0_i32 = arith.constant 0 : i32
    %c0_i32_0 = arith.constant 0 : i32
    %c0_i32_1 = arith.constant 0 : i32
    return %c0_i32, %c0_i32_0 : i32, i32
  }
}

</mosaic_0001>

<bundles_post_ra>
// kernel: biar_forward.5
= control target key start
LH: loop header
LB: loop body
LE: loop exit
PB: predicated region body
PF: predicated region fallthrough
CT: control target
= control target key end

     0   :  { %v32_v21 = vlaneseq  ;;  %v1149_v40 = vmov 0.0   ;;  %s1151_s17 = smov 127   ;;  %vm177_vm1 = vcmask 785408   ;;  %v1152_v59 = vmov 0   ;;  %s1485_s0 = inlined_call_operand.vmem [shape: f32[32,128], index: 0, kind: input, shape index: {}]   ;;  %s1486_s1 = inlined_call_operand.vmem [shape: f32[32,96], index: 1, kind: input, shape index: {}]   ;;  %s1487_s2 = inlined_call_operand.vmem [shape: f32[32,1], index: 2, kind: input, shape index: {}]   ;;  %s1488_s4 = inlined_call_operand.vmem [shape: f32[32,1], index: 4, kind: input, shape index: {}]   ;;  %s1489_s3 = inlined_call_operand.vmem [shape: f32[32,96], index: 3, kind: input, shape index: {}]   ;;  %s1490_s6 = inlined_call_operand.vmem [shape: f32[32,1], index: 6, kind: input, shape index: {}]   ;;  %s1491_s5 = inlined_call_operand.vmem [shape: f32[32,96], index: 5, kind: input, shape index: {}]   ;;  %s1492_s8 = inlined_call_operand.vmem [shape: f32[32,1], index: 8, kind: input, shape index: {}]   ;;  %s1493_s7 = inlined_call_operand.vmem [shape: f32[32,96], index: 7, kind: input, shape index: {}]   ;;  %s1494_s9 = inlined_call_operand.vmem [shape: f32[32,128], index: 9, kind: output, shape index: {}]  }
   0x1   :  { %v1206_v0 = vld [vmem:[%s1485_s0] sm:$0xff]  ;;  %v1211_v1 = vld [vmem:[%s1485_s0 + $0x8] sm:$0xff]  ;;  %v1222_v4 = vld [vmem:[%s1485_s0 + $0x10] sm:$0xff]  ;;  %1132 = vset.pattern.permute.xlu1 %v1152_v59  ;;  %1131 = vset.pattern.permute.xlu0 %v1152_v59 }
   0x2   :  { %69 = vadd.xlane.f32.xlu0 %v1206_v0  ;;  %v77_v2 = vmul.f32 %v1206_v0, %v1206_v0  ;;  %v78_v3 = vmul.f32 %v1211_v1, %v1211_v1  ;;  %v1227_v5 = vld [vmem:[%s1485_s0 + $0x18] sm:$0xff]  ;;  %v79_v6 = vmul.f32 %v1222_v4, %v1222_v4  ;;  %v1235_v28 = vand.u32 127, %v32_v21  ;;  %s1150_s0 = smov 1   ;;  %v149_v58 = vld [vmem:[%s1486_s1] sm:$0xff]  ;;  %v154_v61 = vld [vmem:[%s1487_s2 + $0x8] sm:$0xff] }
   0x3   :  { %v80_v7 = vmul.f32 %v1227_v5, %v1227_v5  ;;  %933 = vmatprep.mubr.msk.f32.mxu0 %vm177_vm1, %v149_v58  ;;  %v153_v60 = vld [vmem:[%s1487_s2] sm:$0xff]  ;;  %v156_v62 = vld [vmem:[%s1487_s2 + $0x18] sm:$0xff]  ;;  %v155_v63 = vld [vmem:[%s1487_s2 + $0x10] sm:$0xff] }
   0x4   :  { %81 = vadd.xlane.f32.xlu1 %v77_v2  ;;  %vm50_vm0 = vcmp.lt.s32.totalorder %v1235_v28, 24 }
   0x5   :  { %v1240_v41 = vsel %vm50_vm0, 1.0, %v1149_v40 }
   0x6   :  { %71 = vadd.xlane.f32.xlu0 %v1211_v1 }
   0x8   :  { %83 = vadd.xlane.f32.xlu1 %v78_v3  ;;  %v1278_v2 = vmul.u32.u64.low 2863311531, %v1235_v28  ;;  %v1279_v3 = vmul.u32.u64.high 2863311531, %v1235_v28, %v1278_v2 }
   0x9   :  { %v314_v2 = vld [vmem:[%s1488_s4 + $0x18] sm:$0xff] }
   0xa   :  { %73 = vadd.xlane.f32.xlu0 %v1222_v4 }
   0xc   :  { %75 = vadd.xlane.f32.xlu1 %v1227_v5 }
   0xe   :  { %85 = vadd.xlane.f32.xlu0 %v79_v6  ;;  %v40_v6 = vshrl.u32 %v1279_v3, 3  ;;  %v313_v3 = vld [vmem:[%s1488_s4 + $0x10] sm:$0xff] }
  0x10   :  { %87 = vadd.xlane.f32.xlu1 %v80_v7  ;;  %v41_v7 = vmul.u32 12, %v40_v6 }
  0x8f   :  { %v70_v8 = vpop.xlane.xlu0 %69 }
  0x90   :  { %v89_v9 = vmul.f32 0.041666668, %v70_v8  ;;  %v42_v8 = vsub.s32 %v1235_v28, %v41_v7 }
  0x91   :  { %v82_v10 = vpop.xlane.xlu1 %81 }
  0x92   :  { %v97_v11 = vmul.f32 %v89_v9, %v89_v9  ;;  %v93_v12 = vmul.f32 0.041666668, %v82_v10  ;;  %v105_v37 = vsub.f32 %v1206_v0, %v89_v9  ;;  %vm45_vm2 = vcmp.ne.s32.totalorder %v42_v8, 0 }
  0x93   :  { %v72_v13 = vpop.xlane.xlu0 %71  ;;  %vm46_vm3 = vcmp.lt.s32.totalorder %v42_v8, 0  ;;  %v48_v9 = vadd.s32 12, %v42_v8 }
  0x94   :  { %v101_v14 = vsub.f32 %v93_v12, %v97_v11  ;;  %v90_v15 = vmul.f32 0.041666668, %v72_v13  ;;  %vm47_vm4 = vmand %vm46_vm3, %vm45_vm2 }
  0x95   :  { %v84_v16 = vpop.xlane.xlu1 %83  ;;  %v49_v10 = vsel %vm47_vm4, %v48_v9, %v42_v8 }
  0x96   :  { %v109_v17 = vadd.f32 1e-05, %v101_v14  ;;  %v98_v18 = vmul.f32 %v90_v15, %v90_v15  ;;  %v94_v19 = vmul.f32 0.041666668, %v84_v16  ;;  %v106_v43 = vsub.f32 %v1211_v1, %v90_v15 }
  0x97   :  { %v74_v20 = vpop.xlane.xlu0 %73  ;;  %v53_v11 = vadd.s32 4294967295, %v49_v10 }
  0x98   :  { %1133 = vrsqrt.f32 %v109_v17  ;;  %v102_v22 = vsub.f32 %v94_v19, %v98_v18  ;;  %v91_v23 = vmul.f32 0.041666668, %v74_v20  ;;  %v59_v19 = vadd.s32 1, %v49_v10 }
  0x99   :  { %v76_v24 = vpop.xlane.xlu1 %75  ;;  %vm54_vm5 = vcmp.ge.s32.totalorder %v53_v11, 0  ;;  %vm55_vm6 = vcmp.lt.s32.totalorder %v53_v11, 12 }
  0x9a   :  { %v110_v25 = vadd.f32 1e-05, %v102_v22  ;;  %v92_v26 = vmul.f32 0.041666668, %v76_v24  ;;  %v99_v29 = vmul.f32 %v91_v23, %v91_v23  ;;  %v107_v48 = vsub.f32 %v1222_v4, %v91_v23  ;;  %vm56_vm7 = vmand %vm54_vm5, %vm55_vm6 }
  0x9b   :  { %v86_v27 = vpop.xlane.xlu0 %85  ;;  %v1284_v12 = vsel %vm56_vm7, 1.0, %v1149_v40  ;;  %vm60_vm8 = vcmp.ge.s32.totalorder %v59_v19, 0  ;;  %vm61_vm9 = vcmp.lt.s32.totalorder %v59_v19, 12 }
  0x9c   :  { %1135 = vrsqrt.f32 %v110_v25  ;;  %v100_v30 = vmul.f32 %v92_v26, %v92_v26  ;;  %v95_v31 = vmul.f32 0.041666668, %v86_v27  ;;  %v108_v51 = vsub.f32 %v1227_v5, %v92_v26  ;;  %vm62_vm10 = vmand %vm60_vm8, %vm61_vm9 }
  0x9d   :  { %v88_v32 = vpop.xlane.xlu1 %87  ;;  %v1292_v25 = vsel %vm62_vm10, 1.0, %v1149_v40 }
  0x9e   :  { %v103_v33 = vsub.f32 %v95_v31, %v99_v29  ;;  %v96_v34 = vmul.f32 0.041666668, %v88_v32 }
  0xa0   :  { %v111_v35 = vadd.f32 1e-05, %v103_v33  ;;  %v104_v36 = vsub.f32 %v96_v34, %v100_v30 }
  0xa2   :  { %v1134_v38 = vpop.eup %1133  ;;  %1137 = vrsqrt.f32 %v111_v35  ;;  %v112_v39 = vadd.f32 1e-05, %v104_v36  ;;  %v150_v35 = vld [vmem:[%s1486_s1 + $0x8] sm:$0xff]  ;;  %v151_v36 = vld [vmem:[%s1486_s1 + $0x10] sm:$0xff] }
  0xa3   :  { %v117_v42 = vmul.f32 %v1134_v38, %v105_v37  ;;  %v152_v37 = vld [vmem:[%s1486_s1 + $0x18] sm:$0xff] }
  0xa4   :  { %1139 = vrsqrt.f32 %v112_v39 }
  0xa5   :  { %v121_v44 = vmul.f32 %v1240_v41, %v117_v42 }
  0xa6   :  { %v1136_v45 = vpop.eup %1135 }
  0xa7   :  { %125 = vrot.lane.b32.xlu0 %v121_v44, %s1150_s0  ;;  %v118_v46 = vmul.f32 %v1136_v45, %v106_v43 }
  0xa9   :  { %v122_v47 = vmul.f32 %v1240_v41, %v118_v46 }
  0xab   :  { %137 = vrot.lane.b32.xlu0 %v121_v44, %s1151_s17  ;;  %127 = vrot.lane.b32.xlu1 %v122_v47, %s1150_s0  ;;  %v1249_v49 = vpack.c.bf16 %v122_v47, %v121_v44 }
  0xac   :  { %v1138_v50 = vpop.eup %1137 }
  0xad   :  { %v119_v52 = vmul.f32 %v1138_v50, %v107_v48 }
  0xae   :  { %v1140_v53 = vpop.eup %1139 }
  0xaf   :  { %v123_v54 = vmul.f32 %v1240_v41, %v119_v52  ;;  %v120_v55 = vmul.f32 %v1140_v53, %v108_v51 }
  0xb1   :  { %141 = vrot.lane.b32.xlu0 %v123_v54, %s1151_s17  ;;  %129 = vrot.lane.b32.xlu1 %v123_v54, %s1150_s0  ;;  %v124_v56 = vmul.f32 %v1240_v41, %v120_v55 }
  0xb3   :  { %v1256_v57 = vpack.c.bf16 %v124_v56, %v123_v54 }
  0xb5   :  { %131 = vrot.lane.b32.xlu1 %v124_v56, %s1150_s0  ;;  %159 = vperm.xlu0 %1131, %v153_v60  }
  0xb9   :  { %139 = vrot.lane.b32.xlu1 %v122_v47, %s1151_s17  ;;  %174 = vperm.xlu0 %1131, %v156_v62   ;;  %v311_v62 = vld [vmem:[%s1488_s4] sm:$0xff] }
  0xbd   :  { %143 = vrot.lane.b32.xlu1 %v124_v56, %s1151_s17 }
  0xc1   :  { %164 = vperm.xlu1 %1132, %v154_v61   ;;  %v312_v61 = vld [vmem:[%s1488_s4 + $0x8] sm:$0xff] }
  0xc5   :  { %169 = vperm.xlu1 %1132, %v155_v63   ;;  %v307_v63 = vld [vmem:[%s1489_s3] sm:$0xff] }
  0xc6   :  { %963 = vmatprep.mubr.msk.f32.mxu1 %vm177_vm1, %v307_v63 }
 0x119   :  { %v126_v13 = vpop.permute.xlu0 %125 }
 0x11a   :  { %v133_v15 = vmul.f32 %v1284_v12, %v126_v13 }
 0x11d   :  { %v128_v14 = vpop.permute.xlu1 %127  ;;  %v138_v26 = vpop.permute.xlu0 %137 }
 0x11e   :  { %v134_v16 = vmul.f32 %v1284_v12, %v128_v14  ;;  %v145_v29 = vmul.f32 %v1292_v25, %v138_v26 }
 0x120   :  { %v1029_v17 = vpack.c.bf16 %v134_v16, %v133_v15 }
 0x122   :  { %1030 = vmatprep.subr.bf16.mxu0 %v1029_v17 }
 0x123   :  { %1032 = vmatpush3.bf16.msra.mxu0 %v1029_v17  ;;  %v130_v18 = vpop.permute.xlu1 %129  ;;  %v142_v30 = vpop.permute.xlu0 %141 }
 0x124   :  { %v135_v21 = vmul.f32 %v1284_v12, %v130_v18  ;;  %v147_v33 = vmul.f32 %v1292_v25, %v142_v30  ;;  %v310_v30 = vld [vmem:[%s1489_s3 + $0x18] sm:$0xff] }
 0x127   :  { %v132_v20 = vpop.permute.xlu1 %131 }
 0x128   :  { %v136_v22 = vmul.f32 %v1284_v12, %v132_v20 }
 0x12a   :  { %v1033_v23 = vpack.c.bf16 %v136_v22, %v135_v21 }
 0x12b   :  { %v140_v24 = vpop.permute.xlu1 %139 }
 0x12c   :  { %1034 = vmatprep.subr.bf16.mxu0 %v1033_v23  ;;  %v146_v27 = vmul.f32 %v1292_v25, %v140_v24 }
 0x12d   :  { %1036 = vmatpush3.bf16.msra.mxu0 %v1033_v23 }
 0x12e   :  { %1038 = vmatprep.subr.bf16.mxu0 %v1249_v49  ;;  %v1045_v31 = vpack.c.bf16 %v146_v27, %v145_v29  ;;  %v309_v29 = vld [vmem:[%s1489_s3 + $0x10] sm:$0xff] }
 0x12f   :  { %v144_v28 = vpop.permute.xlu1 %143 }
 0x130   :  { %v148_v32 = vmul.f32 %v1292_v25, %v144_v28  ;;  %v308_v28 = vld [vmem:[%s1489_s3 + $0x8] sm:$0xff] }
 0x131   :  { %1040 = vmatpush3.bf16.msra.mxu0 %v1249_v49 }
 0x132   :  { %1042 = vmatprep.subr.bf16.mxu0 %v1256_v57  ;;  %v1049_v34 = vpack.c.bf16 %v148_v32, %v147_v33 }
 0x134   :  { %v160_v38 = vpop.permute.xlu0 %159 }
 0x135   :  { %1044 = vmatpush3.bf16.msra.mxu0 %v1256_v57 }
 0x136   :  { %1046 = vmatprep.subr.bf16.mxu0 %v1045_v31 }
 0x138   :  { %v175_v46 = vpop.permute.xlu0 %174 }
 0x139   :  { %1048 = vmatpush3.bf16.msra.mxu0 %v1045_v31 }
 0x13a   :  { %1050 = vmatprep.subr.bf16.mxu0 %v1049_v34 }
 0x13d   :  { %1052 = vmatpush3.bf16.msra.mxu0 %v1049_v34 }
 0x140   :  { %934 = vmatmul.mubr.msk.f32.vlgmr.msra.gmra.mrb[0].mxu0 %vm177_vm1, %v150_v35  ;;  %v165_v39 = vpop.permute.xlu1 %164 }
 0x141   :  { %936 = vmatprep.mubr.msk.f32.mxu0 %vm177_vm1, %v151_v36 }
 0x144   :  { %937 = vmatmul.mubr.msk.f32.gmra.mrb[2].mxu0 %vm177_vm1, %v152_v37  ;;  %v170_v50 = vpop.permute.xlu1 %169 }
 0x213   :  { %v935_v40 = vpop.f32.mrb[0].mxu0 }
 0x214   :  { %v262_v42 = vadd.f32 %v935_v40, %v165_v39  ;;  %v256_v43 = vpop.f32.mrb[1].mxu0 }
 0x215   :  { %v257_v44 = vadd.f32 %v256_v43, %v160_v38 }
 0x216   :  { %v276_v45 = vmax.f32 %v262_v42, 0.0 }
 0x217   :  { %v275_v47 = vmax.f32 %v257_v44, 0.0  ;;  %v938_v48 = vpop.f32.mrb[2].mxu0 }
 0x218   :  { %v280_v49 = vmul.f32 %v1240_v41, %v276_v45  ;;  %v272_v51 = vadd.f32 %v938_v48, %v175_v46  ;;  %v266_v52 = vpop.f32.mrb[3].mxu0 }
 0x219   :  { %v279_v53 = vmul.f32 %v1240_v41, %v275_v47  ;;  %v267_v54 = vadd.f32 %v266_v52, %v170_v50 }
 0x21a   :  { %v278_v55 = vmax.f32 %v272_v51, 0.0  ;;  %285 = vrot.lane.b32.xlu0 %v280_v49, %s1150_s0 }
 0x21b   :  { %v277_v56 = vmax.f32 %v267_v54, 0.0  ;;  %283 = vrot.lane.b32.xlu1 %v279_v53, %s1150_s0  ;;  %v1061_v57 = vpack.c.bf16 %v280_v49, %v279_v53 }
 0x21c   :  { %v282_v58 = vmul.f32 %v1240_v41, %v278_v55 }
 0x21d   :  { %v281_v59 = vmul.f32 %v1240_v41, %v277_v56 }
 0x21e   :  { %289 = vrot.lane.b32.xlu0 %v282_v58, %s1150_s0 }
 0x21f   :  { %287 = vrot.lane.b32.xlu1 %v281_v59, %s1150_s0  ;;  %v1065_v60 = vpack.c.bf16 %v282_v58, %v281_v59 }
 0x222   :  { %297 = vrot.lane.b32.xlu0 %v280_v49, %s1151_s17 }
 0x223   :  { %295 = vrot.lane.b32.xlu1 %v279_v53, %s1151_s17 }
 0x226   :  { %301 = vrot.lane.b32.xlu0 %v282_v58, %s1151_s17 }
 0x227   :  { %299 = vrot.lane.b32.xlu1 %v281_v59, %s1151_s17 }
 0x22a   :  { %322 = vperm.xlu0 %1131, %v312_v61  }
 0x22b   :  { %317 = vperm.xlu1 %1132, %v311_v62  }
 0x22e   :  { %332 = vperm.xlu0 %1131, %v314_v2  }
 0x22f   :  { %327 = vperm.xlu1 %1132, %v313_v3  }
 0x28c   :  { %v286_v6 = vpop.permute.xlu0 %285 }
 0x28d   :  { %v292_v7 = vmul.f32 %v1284_v12, %v286_v6  ;;  %v284_v8 = vpop.permute.xlu1 %283 }
 0x28e   :  { %v291_v9 = vmul.f32 %v1284_v12, %v284_v8 }
 0x290   :  { %v290_v10 = vpop.permute.xlu0 %289  ;;  %v1053_v11 = vpack.c.bf16 %v292_v7, %v291_v9 }
 0x291   :  { %v294_v13 = vmul.f32 %v1284_v12, %v290_v10  ;;  %v288_v14 = vpop.permute.xlu1 %287 }
 0x292   :  { %v293_v15 = vmul.f32 %v1284_v12, %v288_v14  ;;  %1054 = vmatprep.subr.bf16.mxu1 %v1053_v11 }
 0x293   :  { %1056 = vmatpush3.bf16.msra.mxu1 %v1053_v11 }
 0x294   :  { %v1057_v16 = vpack.c.bf16 %v294_v13, %v293_v15  ;;  %v298_v17 = vpop.permute.xlu0 %297 }
 0x295   :  { %v296_v18 = vpop.permute.xlu1 %295  ;;  %v304_v19 = vmul.f32 %v1292_v25, %v298_v17 }
 0x296   :  { %1058 = vmatprep.subr.bf16.mxu1 %v1057_v16  ;;  %v303_v20 = vmul.f32 %v1292_v25, %v296_v18 }
 0x297   :  { %1060 = vmatpush3.bf16.msra.mxu1 %v1057_v16 }
 0x298   :  { %1062 = vmatprep.subr.bf16.mxu1 %v1061_v57  ;;  %v302_v21 = vpop.permute.xlu0 %301  ;;  %v1069_v23 = vpack.c.bf16 %v304_v19, %v303_v20 }
 0x299   :  { %v300_v22 = vpop.permute.xlu1 %299  ;;  %v306_v24 = vmul.f32 %v1292_v25, %v302_v21 }
 0x29a   :  { %v305_v26 = vmul.f32 %v1292_v25, %v300_v22 }
 0x29b   :  { %1064 = vmatpush3.bf16.msra.mxu1 %v1061_v57 }
 0x29c   :  { %1066 = vmatprep.subr.bf16.mxu1 %v1065_v60  ;;  %v1073_v27 = vpack.c.bf16 %v306_v24, %v305_v26 }
 0x29f   :  { %1068 = vmatpush3.bf16.msra.mxu1 %v1065_v60 }
 0x2a0   :  { %1070 = vmatprep.subr.bf16.mxu1 %v1069_v23 }
 0x2a3   :  { %1072 = vmatpush3.bf16.msra.mxu1 %v1069_v23 }
 0x2a4   :  { %1074 = vmatprep.subr.bf16.mxu1 %v1073_v27 }
 0x2a7   :  { %1076 = vmatpush3.bf16.msra.mxu1 %v1073_v27 }
 0x2a9   :  { %v323_v32 = vpop.permute.xlu0 %322 }
 0x2aa   :  { %964 = vmatmul.mubr.msk.f32.vlgmr.msra.gmra.mrb[0].mxu1 %vm177_vm1, %v308_v28  ;;  %v318_v31 = vpop.permute.xlu1 %317 }
 0x2ab   :  { %966 = vmatprep.mubr.msk.f32.mxu1 %vm177_vm1, %v309_v29 }
 0x2ad   :  { %v333_v44 = vpop.permute.xlu0 %332 }
 0x2ae   :  { %967 = vmatmul.mubr.msk.f32.gmra.mrb[2].mxu1 %vm177_vm1, %v310_v30  ;;  %v328_v40 = vpop.permute.xlu1 %327 }
 0x37d   :  { %v965_v33 = vpop.f32.mrb[0].mxu1 }
 0x37e   :  { %v419_v34 = vadd.f32 %v965_v33, %v323_v32  ;;  %v413_v35 = vpop.f32.mrb[1].mxu1 }
 0x37f   :  { %v414_v36 = vadd.f32 %v413_v35, %v318_v31 }
 0x380   :  { %v433_v37 = vmax.f32 %v419_v34, 0.0 }
 0x381   :  { %v432_v38 = vmax.f32 %v414_v36, 0.0  ;;  %v968_v39 = vpop.f32.mrb[2].mxu1 }
 0x382   :  { %v437_v42 = vmul.f32 %v1240_v41, %v433_v37  ;;  %v423_v43 = vpop.f32.mrb[3].mxu1  ;;  %v429_v47 = vadd.f32 %v968_v39, %v333_v44 }
 0x383   :  { %v436_v45 = vmul.f32 %v1240_v41, %v432_v38  ;;  %v424_v46 = vadd.f32 %v423_v43, %v328_v40 }
 0x384   :  { %v441_v48 = vadd.f32 %v437_v42, %v1211_v1  ;;  %v435_v52 = vmax.f32 %v429_v47, 0.0 }
 0x385   :  { %v434_v49 = vmax.f32 %v424_v46, 0.0  ;;  %v440_v50 = vadd.f32 %v436_v45, %v1206_v0 }
 0x386   :  { %446 = vadd.xlane.f32.xlu0 %v441_v48  ;;  %v453_v53 = vmul.f32 %v441_v48, %v441_v48  ;;  %v439_v55 = vmul.f32 %v1240_v41, %v435_v52  ;;  %v524_v52 = vld [vmem:[%s1491_s5] sm:$0xff] }
 0x387   :  { %v438_v51 = vmul.f32 %v1240_v41, %v434_v49  ;;  %444 = vadd.xlane.f32.xlu1 %v440_v50  ;;  %v452_v56 = vmul.f32 %v440_v50, %v440_v50  ;;  %v529_v49 = vld [vmem:[%s1490_s6 + $0x8] sm:$0xff]  ;;  %993 = vmatprep.mubr.msk.f32.mxu0 %vm177_vm1, %v524_v52 }
 0x388   :  { %v443_v58 = vadd.f32 %v439_v55, %v1227_v5 }
 0x389   :  { %v442_v54 = vadd.f32 %v438_v51, %v1222_v4  ;;  %v528_v51 = vld [vmem:[%s1490_s6] sm:$0xff] }
 0x38a   :  { %458 = vadd.xlane.f32.xlu0 %v453_v53  ;;  %v455_v59 = vmul.f32 %v443_v58, %v443_v58  ;;  %v530_v53 = vld [vmem:[%s1490_s6 + $0x10] sm:$0xff] }
 0x38b   :  { %448 = vadd.xlane.f32.xlu1 %v442_v54  ;;  %v454_v57 = vmul.f32 %v442_v54, %v442_v54 }
 0x38e   :  { %456 = vadd.xlane.f32.xlu0 %v452_v56 }
 0x38f   :  { %460 = vadd.xlane.f32.xlu1 %v454_v57 }
 0x392   :  { %450 = vadd.xlane.f32.xlu0 %v443_v58 }
 0x396   :  { %462 = vadd.xlane.f32.xlu0 %v455_v59 }
 0x413   :  { %v447_v60 = vpop.xlane.xlu0 %446 }
 0x414   :  { %v465_v61 = vmul.f32 0.041666668, %v447_v60  ;;  %v445_v62 = vpop.xlane.xlu1 %444 }
 0x415   :  { %v464_v3 = vmul.f32 0.041666668, %v445_v62 }
 0x416   :  { %v473_v2 = vmul.f32 %v465_v61, %v465_v61  ;;  %v481_v29 = vsub.f32 %v441_v48, %v465_v61 }
 0x417   :  { %v459_v63 = vpop.xlane.xlu0 %458  ;;  %v472_v11 = vmul.f32 %v464_v3, %v464_v3  ;;  %v480_v33 = vsub.f32 %v440_v50, %v464_v3  ;;  %v531_v50 = vld [vmem:[%s1490_s6 + $0x18] sm:$0xff] }
 0x418   :  { %v469_v6 = vmul.f32 0.041666668, %v459_v63  ;;  %v449_v7 = vpop.xlane.xlu1 %448 }
 0x419   :  { %v466_v8 = vmul.f32 0.041666668, %v449_v7 }
 0x41a   :  { %v477_v9 = vsub.f32 %v469_v6, %v473_v2 }
 0x41b   :  { %v457_v10 = vpop.xlane.xlu0 %456  ;;  %v474_v16 = vmul.f32 %v466_v8, %v466_v8  ;;  %v482_v37 = vsub.f32 %v442_v54, %v466_v8 }
 0x41c   :  { %v485_v13 = vadd.f32 1e-05, %v477_v9  ;;  %v468_v14 = vmul.f32 0.041666668, %v457_v10  ;;  %v461_v15 = vpop.xlane.xlu1 %460 }
 0x41d   :  { %v470_v17 = vmul.f32 0.041666668, %v461_v15  ;;  %v525_v15 = vld [vmem:[%s1491_s5 + $0x8] sm:$0xff] }
 0x41e   :  { %1141 = vrsqrt.f32 %v485_v13  ;;  %v476_v18 = vsub.f32 %v468_v14, %v472_v11 }
 0x41f   :  { %v478_v19 = vsub.f32 %v470_v17, %v474_v16  ;;  %v451_v20 = vpop.xlane.xlu0 %450  ;;  %v526_v16 = vld [vmem:[%s1491_s5 + $0x10] sm:$0xff]  ;;  %v527_v17 = vld [vmem:[%s1491_s5 + $0x18] sm:$0xff] }
 0x420   :  { %v484_v21 = vadd.f32 1e-05, %v476_v18  ;;  %v467_v22 = vmul.f32 0.041666668, %v451_v20 }
 0x421   :  { %v486_v23 = vadd.f32 1e-05, %v478_v19 }
 0x422   :  { %1143 = vrsqrt.f32 %v484_v21  ;;  %v475_v26 = vmul.f32 %v467_v22, %v467_v22  ;;  %v483_v43 = vsub.f32 %v443_v58, %v467_v22 }
 0x423   :  { %1145 = vrsqrt.f32 %v486_v23  ;;  %v463_v24 = vpop.xlane.xlu0 %462 }
 0x424   :  { %v471_v27 = vmul.f32 0.041666668, %v463_v24 }
 0x426   :  { %v479_v28 = vsub.f32 %v471_v27, %v475_v26 }
 0x428   :  { %v1142_v30 = vpop.eup %1141  ;;  %v487_v31 = vadd.f32 1e-05, %v479_v28 }
 0x429   :  { %v493_v32 = vmul.f32 %v1142_v30, %v481_v29 }
 0x42a   :  { %1147 = vrsqrt.f32 %v487_v31 }
 0x42b   :  { %v497_v34 = vmul.f32 %v1240_v41, %v493_v32 }
 0x42c   :  { %v1144_v35 = vpop.eup %1143 }
 0x42d   :  { %v1146_v36 = vpop.eup %1145  ;;  %502 = vrot.lane.b32.xlu0 %v497_v34, %s1150_s0  ;;  %v492_v38 = vmul.f32 %v1144_v35, %v480_v33 }
 0x42e   :  { %v494_v40 = vmul.f32 %v1146_v36, %v482_v37 }
 0x42f   :  { %v496_v39 = vmul.f32 %v1240_v41, %v492_v38 }
 0x430   :  { %v498_v44 = vmul.f32 %v1240_v41, %v494_v40 }
 0x431   :  { %514 = vrot.lane.b32.xlu0 %v497_v34, %s1151_s17  ;;  %500 = vrot.lane.b32.xlu1 %v496_v39, %s1150_s0  ;;  %v1085_v42 = vpack.c.bf16 %v497_v34, %v496_v39 }
 0x434   :  { %v1148_v45 = vpop.eup %1147 }
 0x435   :  { %504 = vrot.lane.b32.xlu1 %v498_v44, %s1150_s0  ;;  %v495_v46 = vmul.f32 %v1148_v45, %v483_v43  ;;  %v685_v43 = vld [vmem:[%s1492_s8] sm:$0xff]  ;;  %v688_v45 = vld [vmem:[%s1492_s8 + $0x18] sm:$0xff] }
 0x437   :  { %v499_v47 = vmul.f32 %v1240_v41, %v495_v46  ;;  %v687_v46 = vld [vmem:[%s1492_s8 + $0x10] sm:$0xff] }
 0x439   :  { %518 = vrot.lane.b32.xlu0 %v499_v47, %s1151_s17  ;;  %506 = vrot.lane.b32.xlu1 %v499_v47, %s1150_s0  ;;  %v1089_v48 = vpack.c.bf16 %v499_v47, %v498_v44 }
 0x43d   :  { %539 = vperm.xlu0 %1131, %v529_v49   ;;  %512 = vrot.lane.b32.xlu1 %v496_v39, %s1151_s17 }
 0x441   :  { %549 = vperm.xlu0 %1131, %v531_v50   ;;  %516 = vrot.lane.b32.xlu1 %v498_v44, %s1151_s17  ;;  %v681_v44 = vld [vmem:[%s1493_s7] sm:$0xff] }
 0x442   :  { %1023 = vmatprep.mubr.msk.f32.mxu1 %vm177_vm1, %v681_v44 }
 0x445   :  { %534 = vperm.xlu1 %1132, %v528_v51  }
 0x449   :  { %544 = vperm.xlu1 %1132, %v530_v53  }
 0x49f   :  { %v503_v54 = vpop.permute.xlu0 %502 }
 0x4a0   :  { %v509_v56 = vmul.f32 %v1284_v12, %v503_v54 }
 0x4a3   :  { %v501_v55 = vpop.permute.xlu1 %500  ;;  %v515_v3 = vpop.permute.xlu0 %514 }
 0x4a4   :  { %v508_v57 = vmul.f32 %v1284_v12, %v501_v55  ;;  %v521_v8 = vmul.f32 %v1292_v25, %v515_v3 }
 0x4a6   :  { %v1077_v58 = vpack.c.bf16 %v509_v56, %v508_v57 }
 0x4a7   :  { %v505_v59 = vpop.permute.xlu1 %504 }
 0x4a8   :  { %1078 = vmatprep.subr.bf16.mxu0 %v1077_v58  ;;  %v510_v61 = vmul.f32 %v1284_v12, %v505_v59 }
 0x4a9   :  { %1080 = vmatpush3.bf16.msra.mxu0 %v1077_v58 }
 0x4ab   :  { %v507_v60 = vpop.permute.xlu1 %506  ;;  %v519_v9 = vpop.permute.xlu0 %518 }
 0x4ac   :  { %v511_v62 = vmul.f32 %v1284_v12, %v507_v60  ;;  %v523_v13 = vmul.f32 %v1292_v25, %v519_v9 }
 0x4ae   :  { %v1081_v63 = vpack.c.bf16 %v511_v62, %v510_v61 }
 0x4af   :  { %v513_v2 = vpop.permute.xlu1 %512 }
 0x4b0   :  { %1082 = vmatprep.subr.bf16.mxu0 %v1081_v63  ;;  %v520_v6 = vmul.f32 %v1292_v25, %v513_v2 }
 0x4b1   :  { %1084 = vmatpush3.bf16.msra.mxu0 %v1081_v63 }
 0x4b2   :  { %1086 = vmatprep.subr.bf16.mxu0 %v1085_v42  ;;  %v1093_v10 = vpack.c.bf16 %v521_v8, %v520_v6  ;;  %v682_v6 = vld [vmem:[%s1493_s7 + $0x8] sm:$0xff] }
 0x4b3   :  { %v517_v7 = vpop.permute.xlu1 %516 }
 0x4b4   :  { %v522_v11 = vmul.f32 %v1292_v25, %v517_v7  ;;  %v683_v7 = vld [vmem:[%s1493_s7 + $0x10] sm:$0xff] }
 0x4b5   :  { %1088 = vmatpush3.bf16.msra.mxu0 %v1085_v42  ;;  %v686_v42 = vld [vmem:[%s1492_s8 + $0x8] sm:$0xff] }
 0x4b6   :  { %1090 = vmatprep.subr.bf16.mxu0 %v1089_v48  ;;  %v1097_v14 = vpack.c.bf16 %v523_v13, %v522_v11 }
 0x4b9   :  { %1092 = vmatpush3.bf16.msra.mxu0 %v1089_v48 }
 0x4ba   :  { %1094 = vmatprep.subr.bf16.mxu0 %v1093_v10 }
 0x4bc   :  { %v540_v18 = vpop.permute.xlu0 %539 }
 0x4bd   :  { %1096 = vmatpush3.bf16.msra.mxu0 %v1093_v10 }
 0x4be   :  { %1098 = vmatprep.subr.bf16.mxu0 %v1097_v14 }
 0x4c0   :  { %v550_v26 = vpop.permute.xlu0 %549 }
 0x4c1   :  { %1100 = vmatpush3.bf16.msra.mxu0 %v1097_v14 }
 0x4c4   :  { %994 = vmatmul.mubr.msk.f32.vlgmr.msra.gmra.mrb[4].mxu0 %vm177_vm1, %v525_v15  ;;  %v535_v19 = vpop.permute.xlu1 %534 }
 0x4c5   :  { %996 = vmatprep.mubr.msk.f32.mxu0 %vm177_vm1, %v526_v16 }
 0x4c8   :  { %997 = vmatmul.mubr.msk.f32.gmra.mrb[6].mxu0 %vm177_vm1, %v527_v17  ;;  %v545_v29 = vpop.permute.xlu1 %544 }
 0x597   :  { %v995_v20 = vpop.f32.mrb[4].mxu0 }
 0x598   :  { %v636_v21 = vadd.f32 %v995_v20, %v540_v18  ;;  %v630_v22 = vpop.f32.mrb[5].mxu0 }
 0x599   :  { %v631_v23 = vadd.f32 %v630_v22, %v535_v19 }
 0x59a   :  { %v650_v24 = vmax.f32 %v636_v21, 0.0 }
 0x59b   :  { %v649_v27 = vmax.f32 %v631_v23, 0.0  ;;  %v998_v28 = vpop.f32.mrb[6].mxu0 }
 0x59c   :  { %v654_v30 = vmul.f32 %v1240_v41, %v650_v24  ;;  %v646_v31 = vadd.f32 %v998_v28, %v550_v26  ;;  %v640_v32 = vpop.f32.mrb[7].mxu0 }
 0x59d   :  { %v653_v33 = vmul.f32 %v1240_v41, %v649_v27  ;;  %v641_v34 = vadd.f32 %v640_v32, %v545_v29 }
 0x59e   :  { %v652_v35 = vmax.f32 %v646_v31, 0.0  ;;  %659 = vrot.lane.b32.xlu0 %v654_v30, %s1150_s0 }
 0x59f   :  { %v651_v36 = vmax.f32 %v641_v34, 0.0  ;;  %657 = vrot.lane.b32.xlu1 %v653_v33, %s1150_s0  ;;  %v1109_v37 = vpack.c.bf16 %v654_v30, %v653_v33 }
 0x5a0   :  { %v656_v38 = vmul.f32 %v1240_v41, %v652_v35 }
 0x5a1   :  { %v655_v39 = vmul.f32 %v1240_v41, %v651_v36 }
 0x5a2   :  { %663 = vrot.lane.b32.xlu0 %v656_v38, %s1150_s0 }
 0x5a3   :  { %661 = vrot.lane.b32.xlu1 %v655_v39, %s1150_s0  ;;  %v1113_v40 = vpack.c.bf16 %v656_v38, %v655_v39 }
 0x5a6   :  { %671 = vrot.lane.b32.xlu0 %v654_v30, %s1151_s17 }
 0x5a7   :  { %669 = vrot.lane.b32.xlu1 %v653_v33, %s1151_s17 }
 0x5aa   :  { %675 = vrot.lane.b32.xlu0 %v656_v38, %s1151_s17 }
 0x5ab   :  { %673 = vrot.lane.b32.xlu1 %v655_v39, %s1151_s17 }
 0x5ae   :  { %696 = vperm.xlu0 %1131, %v686_v42  }
 0x5af   :  { %691 = vperm.xlu1 %1132, %v685_v43  }
 0x5b2   :  { %706 = vperm.xlu0 %1131, %v688_v45  }
 0x5b3   :  { %701 = vperm.xlu1 %1132, %v687_v46  }
 0x610   :  { %v660_v47 = vpop.permute.xlu0 %659 }
 0x611   :  { %v666_v48 = vmul.f32 %v1284_v12, %v660_v47  ;;  %v658_v49 = vpop.permute.xlu1 %657 }
 0x612   :  { %v665_v50 = vmul.f32 %v1284_v12, %v658_v49 }
 0x614   :  { %v1101_v51 = vpack.c.bf16 %v666_v48, %v665_v50  ;;  %v664_v52 = vpop.permute.xlu0 %663 }
 0x615   :  { %v668_v53 = vmul.f32 %v1284_v12, %v664_v52  ;;  %v662_v54 = vpop.permute.xlu1 %661 }
 0x616   :  { %v667_v55 = vmul.f32 %v1284_v12, %v662_v54  ;;  %1102 = vmatprep.subr.bf16.mxu1 %v1101_v51 }
 0x617   :  { %1104 = vmatpush3.bf16.msra.mxu1 %v1101_v51 }
 0x618   :  { %v1105_v56 = vpack.c.bf16 %v668_v53, %v667_v55  ;;  %v672_v57 = vpop.permute.xlu0 %671 }
 0x619   :  { %v670_v58 = vpop.permute.xlu1 %669  ;;  %v678_v59 = vmul.f32 %v1292_v25, %v672_v57 }
 0x61a   :  { %1106 = vmatprep.subr.bf16.mxu1 %v1105_v56  ;;  %v677_v60 = vmul.f32 %v1292_v25, %v670_v58 }
 0x61b   :  { %1108 = vmatpush3.bf16.msra.mxu1 %v1105_v56 }
 0x61c   :  { %1110 = vmatprep.subr.bf16.mxu1 %v1109_v37  ;;  %v676_v61 = vpop.permute.xlu0 %675  ;;  %v1117_v63 = vpack.c.bf16 %v678_v59, %v677_v60 }
 0x61d   :  { %v674_v62 = vpop.permute.xlu1 %673  ;;  %v680_v2 = vmul.f32 %v1292_v25, %v676_v61 }
 0x61e   :  { %v679_v12 = vmul.f32 %v1292_v25, %v674_v62  ;;  %v684_v25 = vld [vmem:[%s1493_s7 + $0x18] sm:$0xff] }
 0x61f   :  { %1112 = vmatpush3.bf16.msra.mxu1 %v1109_v37 }
 0x620   :  { %1114 = vmatprep.subr.bf16.mxu1 %v1113_v40  ;;  %v1121_v3 = vpack.c.bf16 %v680_v2, %v679_v12 }
 0x623   :  { %1116 = vmatpush3.bf16.msra.mxu1 %v1113_v40 }
 0x624   :  { %1118 = vmatprep.subr.bf16.mxu1 %v1117_v63 }
 0x627   :  { %1120 = vmatpush3.bf16.msra.mxu1 %v1117_v63 }
 0x628   :  { %1122 = vmatprep.subr.bf16.mxu1 %v1121_v3 }
 0x62b   :  { %1124 = vmatpush3.bf16.msra.mxu1 %v1121_v3 }
 0x62d   :  { %v697_v8 = vpop.permute.xlu0 %696 }
 0x62e   :  { %1024 = vmatmul.mubr.msk.f32.vlgmr.msra.gmra.mrb[4].mxu1 %vm177_vm1, %v682_v6  ;;  %v692_v9 = vpop.permute.xlu1 %691 }
 0x62f   :  { %1026 = vmatprep.mubr.msk.f32.mxu1 %vm177_vm1, %v683_v7 }
 0x631   :  { %v707_v16 = vpop.permute.xlu0 %706 }
 0x632   :  { %1027 = vmatmul.mubr.msk.f32.gmra.mrb[6].mxu1 %vm177_vm1, %v684_v25  ;;  %v702_v19 = vpop.permute.xlu1 %701 }
 0x701   :  { %v1025_v10 = vpop.f32.mrb[4].mxu1 }
 0x702   :  { %v793_v11 = vadd.f32 %v1025_v10, %v697_v8  ;;  %v787_v13 = vpop.f32.mrb[5].mxu1 }
 0x703   :  { %v788_v14 = vadd.f32 %v787_v13, %v692_v9 }
 0x704   :  { %v807_v15 = vmax.f32 %v793_v11, 0.0 }
 0x705   :  { %v806_v17 = vmax.f32 %v788_v14, 0.0  ;;  %v1028_v18 = vpop.f32.mrb[6].mxu1 }
 0x706   :  { %v811_v20 = vmul.f32 %v1240_v41, %v807_v15  ;;  %v803_v21 = vadd.f32 %v1028_v18, %v707_v16  ;;  %v797_v22 = vpop.f32.mrb[7].mxu1 }
 0x707   :  { %v810_v23 = vmul.f32 %v1240_v41, %v806_v17  ;;  %v798_v24 = vadd.f32 %v797_v22, %v702_v19 }
 0x708   :  { %v815_v26 = vadd.f32 %v811_v20, %v1211_v1  ;;  %v809_v27 = vmax.f32 %v803_v21, 0.0 }
 0x709   :  { %v814_v28 = vadd.f32 %v810_v23, %v1206_v0  ;;  %v808_v29 = vmax.f32 %v798_v24, 0.0 }
 0x70a   :  { %819 = vst [vmem:[%s1494_s9 + $0x8] sm:$0xff] %v815_v26  ;;  %v813_v30 = vmul.f32 %v1240_v41, %v809_v27 }
 0x70b   :  { %818 = vst [vmem:[%s1494_s9] sm:$0xff] %v814_v28  ;;  %v812_v31 = vmul.f32 %v1240_v41, %v808_v29 }
 0x70c   :  { %v817_v32 = vadd.f32 %v813_v30, %v1227_v5 }
 0x70d   :  { %v816_v1 = vadd.f32 %v812_v31, %v1222_v4 }
 0x70e   :  { %821 = vst [vmem:[%s1494_s9 + $0x18] sm:$0xff] %v817_v32 }
 0x70f   :  { %820 = vst [vmem:[%s1494_s9 + $0x10] sm:$0xff] %v816_v1 }

// kernel: biar_forward.4
= control target key start
LH: loop header
LB: loop body
LE: loop exit
PB: predicated region body
PF: predicated region fallthrough
CT: control target
= control target key end

     0   :  { %v32_v16 = vlaneseq  ;;  %v721_v22 = vmov 0.0   ;;  %vm117_vm1 = vcmask 392192   ;;  %s723_s15 = smov 127   ;;  %v724_v32 = vmov 0   ;;  %s908_s0 = inlined_call_operand.vmem [shape: f32[16,128], index: 0, kind: input, shape index: {}]   ;;  %s909_s1 = inlined_call_operand.vmem [shape: f32[16,48], index: 1, kind: input, shape index: {}]   ;;  %s910_s2 = inlined_call_operand.vmem [shape: f32[16,1], index: 2, kind: input, shape index: {}]   ;;  %s911_s3 = inlined_call_operand.vmem [shape: f32[16,48], index: 3, kind: input, shape index: {}]   ;;  %s912_s4 = inlined_call_operand.vmem [shape: f32[16,1], index: 4, kind: input, shape index: {}]   ;;  %s913_s6 = inlined_call_operand.vmem [shape: f32[16,1], index: 6, kind: input, shape index: {}]   ;;  %s914_s5 = inlined_call_operand.vmem [shape: f32[16,48], index: 5, kind: input, shape index: {}]   ;;  %s915_s8 = inlined_call_operand.vmem [shape: f32[8,1], index: 8, kind: input, shape index: {}]   ;;  %s916_s7 = inlined_call_operand.vmem [shape: f32[8,48], index: 7, kind: input, shape index: {}]   ;;  %s917_s9 = inlined_call_operand.vmem [shape: f32[16,128], index: 9, kind: output, shape index: {}]  }
   0x1   :  { %v780_v0 = vld [vmem:[%s908_s0] sm:$0xff]  ;;  %v785_v1 = vld [vmem:[%s908_s0 + $0x8] sm:$0xff]  ;;  %s722_s0 = smov 1   ;;  %711 = vset.pattern.permute.xlu0 %v724_v32  ;;  %712 = vset.pattern.permute.xlu1 %v724_v32  ;;  %vm726_vm4 = vmmov 0   ;;  %vm549_vm5 = vcmask 1043456  }
   0x2   :  { %63 = vadd.xlane.f32.xlu0 %v780_v0  ;;  %v67_v2 = vmul.f32 %v780_v0, %v780_v0  ;;  %v68_v3 = vmul.f32 %v785_v1, %v785_v1  ;;  %v33_v19 = vand.u32 127, %v32_v16  ;;  %v103_v31 = vld [vmem:[%s909_s1] sm:$0xff]  ;;  %v106_v34 = vld [vmem:[%s910_s2 + $0x8] sm:$0xff] }
   0x3   :  { %612 = vmatprep.mubr.msk.f32.mxu0 %vm117_vm1, %v103_v31  ;;  %v105_v33 = vld [vmem:[%s910_s2] sm:$0xff]  ;;  %v104_v50 = vld [vmem:[%s909_s1 + $0x8] sm:$0xff] }
   0x4   :  { %69 = vadd.xlane.f32.xlu1 %v67_v2  ;;  %vm46_vm0 = vcmp.lt.s32.totalorder %v33_v19, 64  ;;  %v38_v35 = vand.u32 31, %v33_v19  ;;  %v215_v62 = vld [vmem:[%s911_s3] sm:$0xff]  ;;  %v218_v63 = vld [vmem:[%s912_s4 + $0x8] sm:$0xff] }
   0x5   :  { %v795_v23 = vsel %vm46_vm0, 1.0, %v721_v22  ;;  %627 = vmatprep.mubr.msk.f32.mxu1 %vm117_vm1, %v215_v62  ;;  %v217_v2 = vld [vmem:[%s912_s4] sm:$0xff] }
   0x6   :  { %65 = vadd.xlane.f32.xlu0 %v785_v1  ;;  %v49_v36 = vadd.s32 4294967295, %v38_v35  ;;  %v55_v39 = vadd.s32 1, %v38_v35 }
   0x8   :  { %71 = vadd.xlane.f32.xlu1 %v68_v3  ;;  %vm50_vm2 = vcmp.ge.s32.totalorder %v49_v36, 0  ;;  %vm57_vm3 = vcmp.lt.s32.totalorder %v55_v39, 32 }
   0x9   :  { %v815_v37 = vsel %vm50_vm2, 1.0, %v721_v22  ;;  %v820_v45 = vsel %vm57_vm3, 1.0, %v721_v22 }
  0x8f   :  { %v64_v4 = vpop.xlane.xlu0 %63 }
  0x90   :  { %v73_v5 = vmul.f32 0.015625, %v64_v4 }
  0x91   :  { %v70_v6 = vpop.xlane.xlu1 %69 }
  0x92   :  { %v77_v7 = vmul.f32 %v73_v5, %v73_v5  ;;  %v75_v8 = vmul.f32 0.015625, %v70_v6  ;;  %v81_v20 = vsub.f32 %v780_v0, %v73_v5 }
  0x93   :  { %v66_v9 = vpop.xlane.xlu0 %65 }
  0x94   :  { %v79_v10 = vsub.f32 %v75_v8, %v77_v7  ;;  %v74_v11 = vmul.f32 0.015625, %v66_v9 }
  0x95   :  { %v72_v12 = vpop.xlane.xlu1 %71 }
  0x96   :  { %v83_v13 = vadd.f32 1e-05, %v79_v10  ;;  %v78_v14 = vmul.f32 %v74_v11, %v74_v11  ;;  %v76_v15 = vmul.f32 0.015625, %v72_v12  ;;  %v82_v25 = vsub.f32 %v785_v1, %v74_v11 }
  0x98   :  { %713 = vrsqrt.f32 %v83_v13  ;;  %v80_v17 = vsub.f32 %v76_v15, %v78_v14  ;;  %v216_v13 = vld [vmem:[%s911_s3 + $0x8] sm:$0xff] }
  0x9a   :  { %v84_v18 = vadd.f32 1e-05, %v80_v17 }
  0x9c   :  { %715 = vrsqrt.f32 %v84_v18 }
  0xa2   :  { %v714_v21 = vpop.eup %713 }
  0xa3   :  { %v87_v24 = vmul.f32 %v714_v21, %v81_v20 }
  0xa5   :  { %v89_v26 = vmul.f32 %v795_v23, %v87_v24 }
  0xa6   :  { %v716_v27 = vpop.eup %715 }
  0xa7   :  { %91 = vrot.lane.b32.xlu0 %v89_v26, %s722_s0  ;;  %v88_v28 = vmul.f32 %v716_v27, %v82_v25 }
  0xa9   :  { %v90_v29 = vmul.f32 %v795_v23, %v88_v28 }
  0xab   :  { %93 = vrot.lane.b32.xlu1 %v90_v29, %s722_s0  ;;  %v664_v30 = vpack.c.bf16 %v90_v29, %v89_v26  ;;  %109 = vperm.xlu0 %711, %v105_v33  }
  0xaf   :  { %97 = vrot.lane.b32.xlu1 %v89_v26, %s723_s15 }
  0xb3   :  { %99 = vrot.lane.b32.xlu1 %v90_v29, %s723_s15 }
  0xb7   :  { %114 = vperm.xlu1 %712, %v106_v34  }
 0x119   :  { %v92_v38 = vpop.permute.xlu0 %91 }
 0x11a   :  { %v95_v41 = vmul.f32 %v815_v37, %v92_v38 }
 0x11d   :  { %v94_v40 = vpop.permute.xlu1 %93 }
 0x11e   :  { %v96_v42 = vmul.f32 %v815_v37, %v94_v40 }
 0x120   :  { %v660_v43 = vpack.c.bf16 %v96_v42, %v95_v41 }
 0x121   :  { %v98_v44 = vpop.permute.xlu1 %97 }
 0x122   :  { %661 = vmatprep.subr.bf16.mxu0 %v660_v43  ;;  %v101_v47 = vmul.f32 %v820_v45, %v98_v44 }
 0x123   :  { %663 = vmatpush3.bf16.msra.mxu0 %v660_v43 }
 0x124   :  { %665 = vmatprep.subr.bf16.mxu0 %v664_v30 }
 0x125   :  { %v100_v46 = vpop.permute.xlu1 %99 }
 0x126   :  { %v102_v48 = vmul.f32 %v820_v45, %v100_v46 }
 0x127   :  { %667 = vmatpush3.bf16.msra.mxu0 %v664_v30 }
 0x128   :  { %v668_v49 = vpack.c.bf16 %v102_v48, %v101_v47 }
 0x12a   :  { %669 = vmatprep.subr.bf16.mxu0 %v668_v49  ;;  %v110_v52 = vpop.permute.xlu0 %109 }
 0x12b   :  { %671 = vmatpush3.bf16.msra.mxu0 %v668_v49 }
 0x12e   :  { %613 = vmatmul.mubr.msk.f32.vlgmr.msra.gmra.mrb[0].mxu0 %vm117_vm1, %v104_v50 }
 0x136   :  { %v115_v51 = vpop.permute.xlu1 %114 }
 0x201   :  { %v614_v53 = vpop.f32.mrb[0].mxu0 }
 0x202   :  { %v196_v54 = vadd.f32 %v614_v53, %v115_v51  ;;  %v190_v55 = vpop.f32.mrb[1].mxu0 }
 0x203   :  { %v191_v56 = vadd.f32 %v190_v55, %v110_v52  ;;  %v359_v55 = vld [vmem:[%s913_s6 + $0x8] sm:$0xff] }
 0x204   :  { %v200_v57 = vmax.f32 %v196_v54, 0.0 }
 0x205   :  { %v199_v58 = vmax.f32 %v191_v56, 0.0  ;;  %v356_v56 = vld [vmem:[%s914_s5] sm:$0xff] }
 0x206   :  { %v202_v59 = vmul.f32 %v795_v23, %v200_v57  ;;  %642 = vmatprep.mubr.msk.f32.mxu0 %vm117_vm1, %v356_v56  ;;  %v358_v57 = vld [vmem:[%s913_s6] sm:$0xff] }
 0x207   :  { %v201_v60 = vmul.f32 %v795_v23, %v199_v58 }
 0x208   :  { %205 = vrot.lane.b32.xlu0 %v202_v59, %s722_s0 }
 0x209   :  { %203 = vrot.lane.b32.xlu1 %v201_v60, %s722_s0  ;;  %v676_v61 = vpack.c.bf16 %v202_v59, %v201_v60 }
 0x20c   :  { %211 = vrot.lane.b32.xlu0 %v202_v59, %s723_s15 }
 0x20d   :  { %209 = vrot.lane.b32.xlu1 %v201_v60, %s723_s15 }
 0x210   :  { %226 = vperm.xlu0 %711, %v218_v63  }
 0x211   :  { %221 = vperm.xlu1 %712, %v217_v2  }
 0x27a   :  { %v206_v3 = vpop.permute.xlu0 %205 }
 0x27b   :  { %v208_v4 = vmul.f32 %v815_v37, %v206_v3  ;;  %v204_v5 = vpop.permute.xlu1 %203 }
 0x27c   :  { %v207_v6 = vmul.f32 %v815_v37, %v204_v5 }
 0x27e   :  { %v212_v7 = vpop.permute.xlu0 %211  ;;  %v672_v8 = vpack.c.bf16 %v208_v4, %v207_v6  ;;  %v357_v6 = vld [vmem:[%s914_s5 + $0x8] sm:$0xff] }
 0x27f   :  { %v210_v9 = vpop.permute.xlu1 %209  ;;  %v214_v10 = vmul.f32 %v820_v45, %v212_v7  ;;  %v725_v7 = vmov 0.0|0.0  }
 0x280   :  { %v213_v11 = vmul.f32 %v820_v45, %v210_v9  ;;  %673 = vmatprep.subr.bf16.mxu1 %v672_v8 }
 0x281   :  { %675 = vmatpush3.bf16.msra.mxu1 %v672_v8 }
 0x282   :  { %677 = vmatprep.subr.bf16.mxu1 %v676_v61  ;;  %v680_v12 = vpack.c.bf16 %v214_v10, %v213_v11 }
 0x285   :  { %679 = vmatpush3.bf16.msra.mxu1 %v676_v61 }
 0x286   :  { %681 = vmatprep.subr.bf16.mxu1 %v680_v12 }
 0x289   :  { %683 = vmatpush3.bf16.msra.mxu1 %v680_v12 }
 0x28a   :  { %696 = vmatprep.subr.bf16.mxu1 %v725_v7 }
 0x28c   :  { %628 = vmatmul.mubr.msk.f32.vlgmr.msra.gmra.mrb[0].mxu1 %vm117_vm1, %v216_v13 }
 0x28d   :  { %657 = vmatprep.mubr.msk.f32.mxu1 %vm726_vm4, %v721_v22 }
 0x28f   :  { %v227_v14 = vpop.permute.xlu0 %226 }
 0x290   :  { %v222_v16 = vpop.permute.xlu1 %221 }
 0x35f   :  { %v629_v15 = vpop.f32.mrb[0].mxu1 }
 0x360   :  { %v307_v17 = vadd.f32 %v629_v15, %v227_v14  ;;  %v301_v18 = vpop.f32.mrb[1].mxu1 }
 0x361   :  { %v302_v19 = vadd.f32 %v301_v18, %v222_v16 }
 0x362   :  { %v311_v20 = vmax.f32 %v307_v17, 0.0 }
 0x363   :  { %v310_v21 = vmax.f32 %v302_v19, 0.0  ;;  %v468_v19 = vld [vmem:[%s915_s8] sm:$0xff] }
 0x364   :  { %v313_v24 = vmul.f32 %v795_v23, %v311_v20 }
 0x365   :  { %v312_v25 = vmul.f32 %v795_v23, %v310_v21 }
 0x366   :  { %v315_v26 = vadd.f32 %v313_v24, %v785_v1 }
 0x367   :  { %v314_v27 = vadd.f32 %v312_v25, %v780_v0 }
 0x368   :  { %318 = vadd.xlane.f32.xlu0 %v315_v26  ;;  %v321_v29 = vmul.f32 %v315_v26, %v315_v26 }
 0x369   :  { %316 = vadd.xlane.f32.xlu1 %v314_v27  ;;  %v320_v28 = vmul.f32 %v314_v27, %v314_v27 }
 0x36c   :  { %322 = vadd.xlane.f32.xlu0 %v320_v28 }
 0x370   :  { %324 = vadd.xlane.f32.xlu0 %v321_v29 }
 0x3f5   :  { %v319_v30 = vpop.xlane.xlu0 %318 }
 0x3f6   :  { %v317_v31 = vpop.xlane.xlu1 %316  ;;  %v327_v35 = vmul.f32 0.015625, %v319_v30 }
 0x3f7   :  { %v326_v32 = vmul.f32 0.015625, %v317_v31  ;;  %v467_v31 = vld [vmem:[%s916_s7] sm:$0xff] }
 0x3f8   :  { %v331_v40 = vmul.f32 %v327_v35, %v327_v35  ;;  %v335_v49 = vsub.f32 %v315_v26, %v327_v35 }
 0x3f9   :  { %v330_v33 = vmul.f32 %v326_v32, %v326_v32  ;;  %v323_v34 = vpop.xlane.xlu0 %322  ;;  %v334_v46 = vsub.f32 %v314_v27, %v326_v32 }
 0x3fa   :  { %v328_v36 = vmul.f32 0.015625, %v323_v34 }
 0x3fc   :  { %v332_v38 = vsub.f32 %v328_v36, %v330_v33 }
 0x3fd   :  { %v325_v39 = vpop.xlane.xlu0 %324 }
 0x3fe   :  { %v336_v41 = vadd.f32 1e-05, %v332_v38  ;;  %v329_v42 = vmul.f32 0.015625, %v325_v39 }
 0x400   :  { %717 = vrsqrt.f32 %v336_v41  ;;  %v333_v43 = vsub.f32 %v329_v42, %v331_v40 }
 0x402   :  { %v337_v44 = vadd.f32 1e-05, %v333_v43 }
 0x404   :  { %719 = vrsqrt.f32 %v337_v44 }
 0x40a   :  { %v718_v47 = vpop.eup %717 }
 0x40b   :  { %v340_v48 = vmul.f32 %v718_v47, %v334_v46 }
 0x40d   :  { %v342_v50 = vmul.f32 %v795_v23, %v340_v48 }
 0x40e   :  { %v720_v51 = vpop.eup %719 }
 0x40f   :  { %344 = vrot.lane.b32.xlu1 %v342_v50, %s722_s0  ;;  %v341_v52 = vmul.f32 %v720_v51, %v335_v49 }
 0x411   :  { %v343_v53 = vmul.f32 %v795_v23, %v341_v52 }
 0x413   :  { %350 = vrot.lane.b32.xlu1 %v342_v50, %s723_s15  ;;  %346 = vrot.lane.b32.xlu0 %v343_v53, %s722_s0  ;;  %v688_v54 = vpack.c.bf16 %v343_v53, %v342_v50 }
 0x417   :  { %352 = vrot.lane.b32.xlu1 %v343_v53, %s723_s15  ;;  %367 = vperm.xlu0 %711, %v359_v55  }
 0x41b   :  { %362 = vperm.xlu1 %712, %v358_v57  }
 0x481   :  { %v345_v58 = vpop.permute.xlu1 %344 }
 0x482   :  { %v348_v61 = vmul.f32 %v815_v37, %v345_v58 }
 0x485   :  { %v351_v59 = vpop.permute.xlu1 %350  ;;  %v347_v60 = vpop.permute.xlu0 %346 }
 0x486   :  { %v349_v62 = vmul.f32 %v815_v37, %v347_v60  ;;  %v354_v4 = vmul.f32 %v820_v45, %v351_v59 }
 0x488   :  { %v684_v63 = vpack.c.bf16 %v349_v62, %v348_v61 }
 0x489   :  { %v353_v2 = vpop.permute.xlu1 %352 }
 0x48a   :  { %v355_v3 = vmul.f32 %v820_v45, %v353_v2  ;;  %685 = vmatprep.subr.bf16.mxu0 %v684_v63 }
 0x48b   :  { %687 = vmatpush3.bf16.msra.mxu0 %v684_v63 }
 0x48c   :  { %689 = vmatprep.subr.bf16.mxu0 %v688_v54  ;;  %v692_v5 = vpack.c.bf16 %v355_v3, %v354_v4 }
 0x48f   :  { %691 = vmatpush3.bf16.msra.mxu0 %v688_v54 }
 0x490   :  { %693 = vmatprep.subr.bf16.mxu0 %v692_v5 }
 0x493   :  { %695 = vmatpush3.bf16.msra.mxu0 %v692_v5 }
 0x496   :  { %643 = vmatmul.mubr.msk.f32.vlgmr.msra.gmra.mrb[2].mxu0 %vm117_vm1, %v357_v6  ;;  %v368_v8 = vpop.permute.xlu0 %367 }
 0x49a   :  { %v363_v10 = vpop.permute.xlu1 %362 }
 0x569   :  { %v644_v9 = vpop.f32.mrb[2].mxu0 }
 0x56a   :  { %v448_v11 = vadd.f32 %v644_v9, %v368_v8  ;;  %v442_v12 = vpop.f32.mrb[3].mxu0 }
 0x56b   :  { %v443_v13 = vadd.f32 %v442_v12, %v363_v10 }
 0x56c   :  { %v452_v14 = vmax.f32 %v448_v11, 0.0 }
 0x56d   :  { %v451_v15 = vmax.f32 %v443_v13, 0.0 }
 0x56e   :  { %v454_v16 = vmul.f32 %v795_v23, %v452_v14 }
 0x56f   :  { %v453_v17 = vmul.f32 %v795_v23, %v451_v15 }
 0x570   :  { %457 = vrot.lane.b32.xlu0 %v454_v16, %s722_s0 }
 0x571   :  { %455 = vrot.lane.b32.xlu1 %v453_v17, %s722_s0  ;;  %v700_v18 = vpack.c.bf16 %v454_v16, %v453_v17 }
 0x574   :  { %463 = vrot.lane.b32.xlu0 %v454_v16, %s723_s15 }
 0x575   :  { %461 = vrot.lane.b32.xlu1 %v453_v17, %s723_s15 }
 0x579   :  { %471 = vperm.xlu1 %712, %v468_v19  }
 0x5e2   :  { %v458_v20 = vpop.permute.xlu0 %457 }
 0x5e3   :  { %v460_v21 = vmul.f32 %v815_v37, %v458_v20  ;;  %v456_v24 = vpop.permute.xlu1 %455 }
 0x5e4   :  { %v459_v25 = vmul.f32 %v815_v37, %v456_v24  ;;  %v551_v37 = vadd.f32 %v780_v0, %v780_v0 }
 0x5e6   :  { %v697_v26 = vpack.c.bf16 %v460_v21, %v459_v25  ;;  %v464_v27 = vpop.permute.xlu0 %463  ;;  %553 = vst [vmem:[%s917_s9] sm:$0xff] %v551_v37 }
 0x5e7   :  { %v462_v28 = vpop.permute.xlu1 %461  ;;  %v466_v22 = vmul.f32 %v820_v45, %v464_v27 }
 0x5e8   :  { %698 = vmatpush3.bf16.msra.mxu1 %v697_v26  ;;  %v465_v29 = vmul.f32 %v820_v45, %v462_v28 }
 0x5e9   :  { %699 = vmatprep.subr.bf16.mxu1 %v725_v7 }
 0x5ea   :  { %v703_v30 = vpack.c.bf16 %v466_v22, %v465_v29 }
 0x5ec   :  { %701 = vmatpush3.bf16.msra.mxu1 %v700_v18 }
 0x5ed   :  { %702 = vmatprep.subr.bf16.mxu1 %v725_v7 }
 0x5f0   :  { %704 = vmatpush3.bf16.msra.mxu1 %v703_v30 }
 0x5f3   :  { %658 = vmatmul.mubr.msk.f32.vlgmr.msra.gmra.mrb[2].mxu1 %vm117_vm1, %v467_v31 }
 0x5f8   :  { %v472_v32 = vpop.permute.xlu1 %471 }
 0x6c6   :  { %v543_v33 = vpop.f32.mrb[2].mxu1 }
 0x6c7   :  { %v544_v45 = vadd.f32 %v543_v33, %v472_v32  ;;  %v659_v34 = vpop.f32.mrb[3].mxu1 }
 0x6c9   :  { %v547_v35 = vmax.f32 %v544_v45, 0.0 }
 0x6cb   :  { %v548_v36 = vmul.f32 %v795_v23, %v547_v35 }
 0x6cd   :  { %v550_v38 = vsel %vm549_vm5, %v548_v36, 0.0 }
 0x6ce   :  { %v552_v39 = vadd.f32 %v550_v38, %v785_v1 }
 0x6d0   :  { %554 = vst [vmem:[%s917_s9 + $0x8] sm:$0xff] %v552_v39 }

</bundles_post_ra>
